<compile_context>
chip_gen: v7x
topology: tpu7x:2x2x1
jax: 0.10.0
libtpu: 0.0.40
codegen_flags: <defaults>
</compile_context>

<pallas_src>
import numpy as np
import jax
import jax.numpy as jnp
from jax import lax
from jax.experimental import pallas as pl
from jax.experimental.pallas import tpu as pltpu

EPS = 1e-5


# ------------------------------ Pallas kernel --------------------------------

def _bn_relu(y, s_ref, st_ref, g_ref, b_ref):
    """Training-mode BatchNorm (biased var, batch-global stats) + ReLU.

    y:   (N, C*S) activations, columns channel-major ((c, spatial) blocks).
    s:   (C*S, C) 0/1 column->channel indicator   (per-channel reduce).
    st:  (C, C*S) its transpose                   (per-channel -> per-column).
    """
    C = g_ref.shape[1]
    spatial = y.shape[1] // C
    inv_cnt = 1.0 / float(y.shape[0] * spatial)

    colsum = jnp.sum(y, axis=0, keepdims=True)          # (1, C*S)
    colsq = jnp.sum(y * y, axis=0, keepdims=True)       # (1, C*S)
    mean = jnp.dot(colsum, s_ref[...], preferred_element_type=jnp.float32) * inv_cnt
    ex2 = jnp.dot(colsq, s_ref[...], preferred_element_type=jnp.float32) * inv_cnt
    var = ex2 - mean * mean                              # single-pass variance
    sc = g_ref[...] * lax.rsqrt(var + EPS)               # (1, C)
    sh = b_ref[...] - mean * sc                          # (1, C)
    sc_col = jnp.dot(sc, st_ref[...], preferred_element_type=jnp.float32)  # (1, C*S)
    sh_col = jnp.dot(sh, st_ref[...], preferred_element_type=jnp.float32)
    return jnp.maximum(y * sc_col + sh_col, 0.0)


def digits_fused_kernel(x_ref, t1_ref, s1_ref, s1t_ref, g1_ref, b1_ref,
                        pp_ref, s2_ref, s2t_ref, g2_ref, b2_ref,
                        t2_ref, s3_ref, s3t_ref, g3_ref, b3_ref,
                        wl_ref, bl_ref, o_ref):
    x = x_ref[...]                                               # (N, 64)

    # conv1 (1->7, k=3) as one Toeplitz matmul. Bias omitted: cancelled by BN.
    y1 = jnp.dot(x, t1_ref[...], preferred_element_type=jnp.float32)   # (N, 252)
    a1 = _bn_relu(y1, s1_ref, s1t_ref, g1_ref, b1_ref)

    # maxpool 2x2: gather each of the 4 taps with a 0/1 selection matmul, then max.
    m = jnp.dot(a1, pp_ref[0], preferred_element_type=jnp.float32)      # (N, 63)
    for t in range(1, 4):
        m = jnp.maximum(m, jnp.dot(a1, pp_ref[t],
                                   preferred_element_type=jnp.float32))
    a2 = _bn_relu(m, s2_ref, s2t_ref, g2_ref, b2_ref)

    # conv2 (7->3, k=2) as one Toeplitz matmul (output cols already channel-major
    # = PyTorch flatten order, so "flatten" is a no-op).
    y3 = jnp.dot(a2, t2_ref[...], preferred_element_type=jnp.float32)   # (N, 12)
    a3 = _bn_relu(y3, s3_ref, s3t_ref, g3_ref, b3_ref)

    # linear (12 -> 10)
    o_ref[...] = jnp.dot(a3, wl_ref[...],
                         preferred_element_type=jnp.float32) + bl_ref[...]


# ------------------------------- JAX wrapper ----------------------------------

@jax.jit
def digits_convnet_forward(xb, pk):
    """xb: (N, 8, 8) float32 -> (N, 10) float32 (matches DigitsConvNet.forward)."""
    N = xb.shape[0]
    xf = xb.astype(jnp.float32).reshape(N, 64)      # row-major flatten of each image

    args = (xf, pk["t1"], pk["s1"], pk["s1t"], pk["g1"], pk["be1"],
            pk["pp"], pk["s2"], pk["s2t"], pk["g2"], pk["be2"],
            pk["t2"], pk["s3"], pk["s3t"], pk["g3"], pk["be3"],
            pk["wl"], pk["bl"])

    return pl.pallas_call(
        digits_fused_kernel,
        out_shape=jax.ShapeDtypeStruct((N, 10), jnp.float32),
        in_specs=[pl.BlockSpec(memory_space=pltpu.MemorySpace.VMEM)] * len(args),
        out_specs=pl.BlockSpec(memory_space=pltpu.MemorySpace.VMEM),
        compiler_params=pltpu.CompilerParams(vmem_limit_bytes=32 * 1024 * 1024),
    )(*args)


# ---------------------- one-time parameter packing ----------------------------

def _chan_indicator(C, spatial):
    s = np.zeros((C * spatial, C), np.float32)
    for c in range(C):
        s[c * spatial:(c + 1) * spatial, c] = 1.0
    return s


def pack_params(p):
    """Fold weights into Toeplitz/selection matrices once (hoisted out of forward)."""
    w1 = np.asarray(p["w1"], np.float32)   # (7,1,3,3)
    w2 = np.asarray(p["w2"], np.float32)   # (3,7,2,2)
    wl = np.asarray(p["wl"], np.float32)   # (10,12)

    # conv1: x(N,64) @ t1(64,252) ; y1 columns = (c_out, oh, ow), oh,ow in 6x6.
    t1 = np.zeros((64, 7 * 36), np.float32)
    for co in range(7):
        for oh in range(6):
            for ow in range(6):
                col = co * 36 + oh * 6 + ow
                for ky in range(3):
                    for kx in range(3):
                        t1[(oh + ky) * 8 + (ow + kx), col] += w1[co, 0, ky, kx]

    # maxpool taps: a1(N,252) @ pp[t](252,63) ; out columns = (c, ph, pw) in 3x3.
    pp = np.zeros((4, 252, 63), np.float32)
    for t, (dy, dx) in enumerate(((0, 0), (0, 1), (1, 0), (1, 1))):
        for co in range(7):
            for ph in range(3):
                for pw in range(3):
                    src = co * 36 + (2 * ph + dy) * 6 + (2 * pw + dx)
                    pp[t, src, co * 9 + ph * 3 + pw] = 1.0

    # conv2: a2(N,63) @ t2(63,12) ; out columns = (c_out, oh, ow) in 2x2
    # (= PyTorch channel-major flatten order).
    t2 = np.zeros((63, 12), np.float32)
    for co in range(3):
        for oh in range(2):
            for ow in range(2):
                col = co * 4 + oh * 2 + ow
                for ci in range(7):
                    for ky in range(2):
                        for kx in range(2):
                            t2[ci * 9 + (oh + ky) * 3 + (ow + kx), col] += \
                                w2[co, ci, ky, kx]

    s1 = _chan_indicator(7, 36)
    s2 = _chan_indicator(7, 9)
    s3 = _chan_indicator(3, 4)

    def j(a):
        return jnp.asarray(a, jnp.float32)

    return dict(
        t1=j(t1), s1=j(s1), s1t=j(np.ascontiguousarray(s1.T)),
        g1=j(np.asarray(p["g1"]).reshape(1, 7)), be1=j(np.asarray(p["be1"]).reshape(1, 7)),
        pp=j(pp), s2=j(s2), s2t=j(np.ascontiguousarray(s2.T)),
        g2=j(np.asarray(p["g2"]).reshape(1, 7)), be2=j(np.asarray(p["be2"]).reshape(1, 7)),
        t2=j(t2), s3=j(s3), s3t=j(np.ascontiguousarray(s3.T)),
        g3=j(np.asarray(p["g3"]).reshape(1, 3)), be3=j(np.asarray(p["be3"]).reshape(1, 3)),
        wl=j(np.ascontiguousarray(wl.T)), bl=j(np.asarray(p["bl"]).reshape(1, 10)),
    )


# ------------------------ deterministic parameters -----------------------------

def init_params():
    key = jax.random.PRNGKey(0)
    ks = jax.random.split(key, 6)

    def u(k, shape, fan_in):
        b = 1.0 / float(np.sqrt(fan_in))
        return jax.random.uniform(k, shape, jnp.float32, -b, b)

    return dict(
        w1=u(ks[0], (7, 1, 3, 3), 9),   b1=u(ks[1], (7,), 9),      # Conv2d(1,7,3)
        w2=u(ks[2], (3, 7, 2, 2), 28),  b2=u(ks[3], (3,), 28),     # Conv2d(7,3,2)
        wl=u(ks[4], (10, 12), 12),      bl=u(ks[5], (10,), 12),    # Linear(12,10)
        g1=jnp.ones((7,), jnp.float32), be1=jnp.zeros((7,), jnp.float32),
        g2=jnp.ones((7,), jnp.float32), be2=jnp.zeros((7,), jnp.float32),
        g3=jnp.ones((3,), jnp.float32), be3=jnp.zeros((3,), jnp.float32),
    )


# ---------------------------- pure-JAX reference -------------------------------

def reference_forward(xb, p):
    dn = ("NCHW", "OIHW", "NCHW")

    def bn(y, g, b):
        m = y.mean(axis=(0, 2, 3), keepdims=True)
        v = ((y - m) ** 2).mean(axis=(0, 2, 3), keepdims=True)
        return (y - m) / jnp.sqrt(v + EPS) * g.reshape(1, -1, 1, 1) + b.reshape(1, -1, 1, 1)

    x = xb[:, None, :, :]
    y = lax.conv_general_dilated(x, p["w1"], (1, 1), "VALID", dimension_numbers=dn,
                                 precision=lax.Precision.HIGHEST) + p["b1"].reshape(1, -1, 1, 1)
    y = jnp.maximum(bn(y, p["g1"], p["be1"]), 0.0)
    y = lax.reduce_window(y, -jnp.inf, lax.max, (1, 1, 2, 2), (1, 1, 2, 2), "VALID")
    y = jnp.maximum(bn(y, p["g2"], p["be2"]), 0.0)
    y = lax.conv_general_dilated(y, p["w2"], (1, 1), "VALID", dimension_numbers=dn,
                                 precision=lax.Precision.HIGHEST) + p["b2"].reshape(1, -1, 1, 1)
    y = jnp.maximum(bn(y, p["g3"], p["be3"]), 0.0)
    flat = y.reshape(y.shape[0], -1)
    return jnp.dot(flat, p["wl"].T, precision=lax.Precision.HIGHEST) + p["bl"]


# ------------------------------------ main -------------------------------------

if __name__ == "__main__":
    params = init_params()
    packed = pack_params(params)

    xb = jax.random.normal(jax.random.PRNGKey(0), (16, 8, 8), jnp.float32)

    out = jax.block_until_ready(digits_convnet_forward(xb, packed))
    assert out.shape == (16, 10) and out.dtype == jnp.float32

    ref = reference_forward(xb, params)
    assert jnp.allclose(out, ref, atol=1e-2, rtol=1e-2), "mismatch vs pure-JAX reference"

    print("KERNEL_OK")
</pallas_src>

<mosaic_0001>
module attributes {stable_mosaic.version = 11 : i64} {
  func.func @digits_fused_kernel(%arg0: memref<16x64xf32, #tpu.memory_space<vmem>>, %arg1: memref<64x252xf32, #tpu.memory_space<vmem>>, %arg2: memref<252x7xf32, #tpu.memory_space<vmem>>, %arg3: memref<7x252xf32, #tpu.memory_space<vmem>>, %arg4: memref<1x7xf32, #tpu.memory_space<vmem>>, %arg5: memref<1x7xf32, #tpu.memory_space<vmem>>, %arg6: memref<4x252x63xf32, #tpu.memory_space<vmem>>, %arg7: memref<63x7xf32, #tpu.memory_space<vmem>>, %arg8: memref<7x63xf32, #tpu.memory_space<vmem>>, %arg9: memref<1x7xf32, #tpu.memory_space<vmem>>, %arg10: memref<1x7xf32, #tpu.memory_space<vmem>>, %arg11: memref<63x12xf32, #tpu.memory_space<vmem>>, %arg12: memref<12x3xf32, #tpu.memory_space<vmem>>, %arg13: memref<3x12xf32, #tpu.memory_space<vmem>>, %arg14: memref<1x3xf32, #tpu.memory_space<vmem>>, %arg15: memref<1x3xf32, #tpu.memory_space<vmem>>, %arg16: memref<12x10xf32, #tpu.memory_space<vmem>>, %arg17: memref<1x10xf32, #tpu.memory_space<vmem>>, %arg18: memref<16x10xf32, #tpu.memory_space<vmem>>) attributes {dimension_semantics = [], scalar_prefetch = 0 : i64, scratch_operands = 0 : i64, tpu.core_type = #tpu.core_type<tc>} {
    %c0 = arith.constant 0 : index
    %c0_0 = arith.constant 0 : index
    %0 = vector.load %arg0[%c0, %c0_0] : memref<16x64xf32, #tpu.memory_space<vmem>>, vector<16x64xf32>
    %c0_1 = arith.constant 0 : index
    %c0_2 = arith.constant 0 : index
    %1 = vector.load %arg1[%c0_1, %c0_2] : memref<64x252xf32, #tpu.memory_space<vmem>>, vector<64x252xf32>
    %cst = arith.constant dense<0.000000e+00> : vector<16x252xf32>
    %2 = tpu.matmul %0, %1, %cst {dimension_numbers = #tpu.dot_dimension_numbers<[1], [0], [0], [1], [0, 0, 1, 1], [], []>} : vector<16x64xf32>, vector<64x252xf32>, vector<16x252xf32> -> vector<16x252xf32>
    %cst_3 = arith.constant dense<0.000000e+00> : vector<252xf32>
    %3 = vector.multi_reduction <add>, %2, %cst_3 [0] : vector<16x252xf32> to vector<252xf32>
    %4 = vector.shape_cast %3 : vector<252xf32> to vector<1x252xf32>
    %5 = arith.mulf %2, %2 : vector<16x252xf32>
    %cst_4 = arith.constant dense<0.000000e+00> : vector<252xf32>
    %6 = vector.multi_reduction <add>, %5, %cst_4 [0] : vector<16x252xf32> to vector<252xf32>
    %7 = vector.shape_cast %6 : vector<252xf32> to vector<1x252xf32>
    %c0_5 = arith.constant 0 : index
    %c0_6 = arith.constant 0 : index
    %8 = vector.load %arg2[%c0_5, %c0_6] : memref<252x7xf32, #tpu.memory_space<vmem>>, vector<252x7xf32>
    %cst_7 = arith.constant dense<0.000000e+00> : vector<1x7xf32>
    %9 = tpu.matmul %4, %8, %cst_7 {dimension_numbers = #tpu.dot_dimension_numbers<[1], [0], [0], [1], [0, 0, 1, 1], [], []>} : vector<1x252xf32>, vector<252x7xf32>, vector<1x7xf32> -> vector<1x7xf32>
    %cst_8 = arith.constant 0.00173611112 : f32
    %10 = vector.broadcast %cst_8 : f32 to vector<1x7xf32>
    %11 = arith.mulf %9, %10 : vector<1x7xf32>
    %c0_9 = arith.constant 0 : index
    %c0_10 = arith.constant 0 : index
    %12 = vector.load %arg2[%c0_9, %c0_10] : memref<252x7xf32, #tpu.memory_space<vmem>>, vector<252x7xf32>
    %cst_11 = arith.constant dense<0.000000e+00> : vector<1x7xf32>
    %13 = tpu.matmul %7, %12, %cst_11 {dimension_numbers = #tpu.dot_dimension_numbers<[1], [0], [0], [1], [0, 0, 1, 1], [], []>} : vector<1x252xf32>, vector<252x7xf32>, vector<1x7xf32> -> vector<1x7xf32>
    %cst_12 = arith.constant 0.00173611112 : f32
    %14 = vector.broadcast %cst_12 : f32 to vector<1x7xf32>
    %15 = arith.mulf %13, %14 : vector<1x7xf32>
    %16 = arith.mulf %11, %11 : vector<1x7xf32>
    %17 = arith.subf %15, %16 : vector<1x7xf32>
    %c0_13 = arith.constant 0 : index
    %c0_14 = arith.constant 0 : index
    %18 = vector.load %arg4[%c0_13, %c0_14] : memref<1x7xf32, #tpu.memory_space<vmem>>, vector<1x7xf32>
    %cst_15 = arith.constant 9.99999974E-6 : f32
    %19 = vector.broadcast %cst_15 : f32 to vector<1x7xf32>
    %20 = arith.addf %17, %19 : vector<1x7xf32>
    %21 = math.rsqrt %20 : vector<1x7xf32>
    %22 = arith.mulf %18, %21 : vector<1x7xf32>
    %c0_16 = arith.constant 0 : index
    %c0_17 = arith.constant 0 : index
    %23 = vector.load %arg5[%c0_16, %c0_17] : memref<1x7xf32, #tpu.memory_space<vmem>>, vector<1x7xf32>
    %24 = arith.mulf %11, %22 : vector<1x7xf32>
    %25 = arith.subf %23, %24 : vector<1x7xf32>
    %c0_18 = arith.constant 0 : index
    %c0_19 = arith.constant 0 : index
    %26 = vector.load %arg3[%c0_18, %c0_19] : memref<7x252xf32, #tpu.memory_space<vmem>>, vector<7x252xf32>
    %cst_20 = arith.constant dense<0.000000e+00> : vector<1x252xf32>
    %27 = tpu.matmul %22, %26, %cst_20 {dimension_numbers = #tpu.dot_dimension_numbers<[1], [0], [0], [1], [0, 0, 1, 1], [], []>} : vector<1x7xf32>, vector<7x252xf32>, vector<1x252xf32> -> vector<1x252xf32>
    %c0_21 = arith.constant 0 : index
    %c0_22 = arith.constant 0 : index
    %28 = vector.load %arg3[%c0_21, %c0_22] : memref<7x252xf32, #tpu.memory_space<vmem>>, vector<7x252xf32>
    %cst_23 = arith.constant dense<0.000000e+00> : vector<1x252xf32>
    %29 = tpu.matmul %25, %28, %cst_23 {dimension_numbers = #tpu.dot_dimension_numbers<[1], [0], [0], [1], [0, 0, 1, 1], [], []>} : vector<1x7xf32>, vector<7x252xf32>, vector<1x252xf32> -> vector<1x252xf32>
    %30 = vector.broadcast %27 : vector<1x252xf32> to vector<16x252xf32>
    %31 = arith.mulf %2, %30 : vector<16x252xf32>
    %32 = vector.broadcast %29 : vector<1x252xf32> to vector<16x252xf32>
    %33 = arith.addf %31, %32 : vector<16x252xf32>
    %cst_24 = arith.constant 0.000000e+00 : f32
    %34 = vector.broadcast %cst_24 : f32 to vector<16x252xf32>
    %35 = arith.maximumf %33, %34 : vector<16x252xf32>
    %c0_25 = arith.constant 0 : index
    %c0_26 = arith.constant 0 : index
    %c0_27 = arith.constant 0 : index
    %36 = vector.load %arg6[%c0_25, %c0_26, %c0_27] : memref<4x252x63xf32, #tpu.memory_space<vmem>>, vector<1x252x63xf32>
    %37 = vector.shape_cast %36 : vector<1x252x63xf32> to vector<252x63xf32>
    %cst_28 = arith.constant dense<0.000000e+00> : vector<16x63xf32>
    %38 = tpu.matmul %35, %37, %cst_28 {dimension_numbers = #tpu.dot_dimension_numbers<[1], [0], [0], [1], [0, 0, 1, 1], [], []>} : vector<16x252xf32>, vector<252x63xf32>, vector<16x63xf32> -> vector<16x63xf32>
    %c1 = arith.constant 1 : index
    %c0_29 = arith.constant 0 : index
    %c0_30 = arith.constant 0 : index
    %39 = vector.load %arg6[%c1, %c0_29, %c0_30] : memref<4x252x63xf32, #tpu.memory_space<vmem>>, vector<1x252x63xf32>
    %40 = vector.shape_cast %39 : vector<1x252x63xf32> to vector<252x63xf32>
    %cst_31 = arith.constant dense<0.000000e+00> : vector<16x63xf32>
    %41 = tpu.matmul %35, %40, %cst_31 {dimension_numbers = #tpu.dot_dimension_numbers<[1], [0], [0], [1], [0, 0, 1, 1], [], []>} : vector<16x252xf32>, vector<252x63xf32>, vector<16x63xf32> -> vector<16x63xf32>
    %42 = arith.maximumf %38, %41 : vector<16x63xf32>
    %c2 = arith.constant 2 : index
    %c0_32 = arith.constant 0 : index
    %c0_33 = arith.constant 0 : index
    %43 = vector.load %arg6[%c2, %c0_32, %c0_33] : memref<4x252x63xf32, #tpu.memory_space<vmem>>, vector<1x252x63xf32>
    %44 = vector.shape_cast %43 : vector<1x252x63xf32> to vector<252x63xf32>
    %cst_34 = arith.constant dense<0.000000e+00> : vector<16x63xf32>
    %45 = tpu.matmul %35, %44, %cst_34 {dimension_numbers = #tpu.dot_dimension_numbers<[1], [0], [0], [1], [0, 0, 1, 1], [], []>} : vector<16x252xf32>, vector<252x63xf32>, vector<16x63xf32> -> vector<16x63xf32>
    %46 = arith.maximumf %42, %45 : vector<16x63xf32>
    %c3 = arith.constant 3 : index
    %c0_35 = arith.constant 0 : index
    %c0_36 = arith.constant 0 : index
    %47 = vector.load %arg6[%c3, %c0_35, %c0_36] : memref<4x252x63xf32, #tpu.memory_space<vmem>>, vector<1x252x63xf32>
    %48 = vector.shape_cast %47 : vector<1x252x63xf32> to vector<252x63xf32>
    %cst_37 = arith.constant dense<0.000000e+00> : vector<16x63xf32>
    %49 = tpu.matmul %35, %48, %cst_37 {dimension_numbers = #tpu.dot_dimension_numbers<[1], [0], [0], [1], [0, 0, 1, 1], [], []>} : vector<16x252xf32>, vector<252x63xf32>, vector<16x63xf32> -> vector<16x63xf32>
    %50 = arith.maximumf %46, %49 : vector<16x63xf32>
    %cst_38 = arith.constant dense<0.000000e+00> : vector<63xf32>
    %51 = vector.multi_reduction <add>, %50, %cst_38 [0] : vector<16x63xf32> to vector<63xf32>
    %52 = vector.shape_cast %51 : vector<63xf32> to vector<1x63xf32>
    %53 = arith.mulf %50, %50 : vector<16x63xf32>
    %cst_39 = arith.constant dense<0.000000e+00> : vector<63xf32>
    %54 = vector.multi_reduction <add>, %53, %cst_39 [0] : vector<16x63xf32> to vector<63xf32>
    %55 = vector.shape_cast %54 : vector<63xf32> to vector<1x63xf32>
    %c0_40 = arith.constant 0 : index
    %c0_41 = arith.constant 0 : index
    %56 = vector.load %arg7[%c0_40, %c0_41] : memref<63x7xf32, #tpu.memory_space<vmem>>, vector<63x7xf32>
    %cst_42 = arith.constant dense<0.000000e+00> : vector<1x7xf32>
    %57 = tpu.matmul %52, %56, %cst_42 {dimension_numbers = #tpu.dot_dimension_numbers<[1], [0], [0], [1], [0, 0, 1, 1], [], []>} : vector<1x63xf32>, vector<63x7xf32>, vector<1x7xf32> -> vector<1x7xf32>
    %cst_43 = arith.constant 0.0069444445 : f32
    %58 = vector.broadcast %cst_43 : f32 to vector<1x7xf32>
    %59 = arith.mulf %57, %58 : vector<1x7xf32>
    %c0_44 = arith.constant 0 : index
    %c0_45 = arith.constant 0 : index
    %60 = vector.load %arg7[%c0_44, %c0_45] : memref<63x7xf32, #tpu.memory_space<vmem>>, vector<63x7xf32>
    %cst_46 = arith.constant dense<0.000000e+00> : vector<1x7xf32>
    %61 = tpu.matmul %55, %60, %cst_46 {dimension_numbers = #tpu.dot_dimension_numbers<[1], [0], [0], [1], [0, 0, 1, 1], [], []>} : vector<1x63xf32>, vector<63x7xf32>, vector<1x7xf32> -> vector<1x7xf32>
    %cst_47 = arith.constant 0.0069444445 : f32
    %62 = vector.broadcast %cst_47 : f32 to vector<1x7xf32>
    %63 = arith.mulf %61, %62 : vector<1x7xf32>
    %64 = arith.mulf %59, %59 : vector<1x7xf32>
    %65 = arith.subf %63, %64 : vector<1x7xf32>
    %c0_48 = arith.constant 0 : index
    %c0_49 = arith.constant 0 : index
    %66 = vector.load %arg9[%c0_48, %c0_49] : memref<1x7xf32, #tpu.memory_space<vmem>>, vector<1x7xf32>
    %cst_50 = arith.constant 9.99999974E-6 : f32
    %67 = vector.broadcast %cst_50 : f32 to vector<1x7xf32>
    %68 = arith.addf %65, %67 : vector<1x7xf32>
    %69 = math.rsqrt %68 : vector<1x7xf32>
    %70 = arith.mulf %66, %69 : vector<1x7xf32>
    %c0_51 = arith.constant 0 : index
    %c0_52 = arith.constant 0 : index
    %71 = vector.load %arg10[%c0_51, %c0_52] : memref<1x7xf32, #tpu.memory_space<vmem>>, vector<1x7xf32>
    %72 = arith.mulf %59, %70 : vector<1x7xf32>
    %73 = arith.subf %71, %72 : vector<1x7xf32>
    %c0_53 = arith.constant 0 : index
    %c0_54 = arith.constant 0 : index
    %74 = vector.load %arg8[%c0_53, %c0_54] : memref<7x63xf32, #tpu.memory_space<vmem>>, vector<7x63xf32>
    %cst_55 = arith.constant dense<0.000000e+00> : vector<1x63xf32>
    %75 = tpu.matmul %70, %74, %cst_55 {dimension_numbers = #tpu.dot_dimension_numbers<[1], [0], [0], [1], [0, 0, 1, 1], [], []>} : vector<1x7xf32>, vector<7x63xf32>, vector<1x63xf32> -> vector<1x63xf32>
    %c0_56 = arith.constant 0 : index
    %c0_57 = arith.constant 0 : index
    %76 = vector.load %arg8[%c0_56, %c0_57] : memref<7x63xf32, #tpu.memory_space<vmem>>, vector<7x63xf32>
    %cst_58 = arith.constant dense<0.000000e+00> : vector<1x63xf32>
    %77 = tpu.matmul %73, %76, %cst_58 {dimension_numbers = #tpu.dot_dimension_numbers<[1], [0], [0], [1], [0, 0, 1, 1], [], []>} : vector<1x7xf32>, vector<7x63xf32>, vector<1x63xf32> -> vector<1x63xf32>
    %78 = vector.broadcast %75 : vector<1x63xf32> to vector<16x63xf32>
    %79 = arith.mulf %50, %78 : vector<16x63xf32>
    %80 = vector.broadcast %77 : vector<1x63xf32> to vector<16x63xf32>
    %81 = arith.addf %79, %80 : vector<16x63xf32>
    %cst_59 = arith.constant 0.000000e+00 : f32
    %82 = vector.broadcast %cst_59 : f32 to vector<16x63xf32>
    %83 = arith.maximumf %81, %82 : vector<16x63xf32>
    %c0_60 = arith.constant 0 : index
    %c0_61 = arith.constant 0 : index
    %84 = vector.load %arg11[%c0_60, %c0_61] : memref<63x12xf32, #tpu.memory_space<vmem>>, vector<63x12xf32>
    %cst_62 = arith.constant dense<0.000000e+00> : vector<16x12xf32>
    %85 = tpu.matmul %83, %84, %cst_62 {dimension_numbers = #tpu.dot_dimension_numbers<[1], [0], [0], [1], [0, 0, 1, 1], [], []>} : vector<16x63xf32>, vector<63x12xf32>, vector<16x12xf32> -> vector<16x12xf32>
    %cst_63 = arith.constant dense<0.000000e+00> : vector<12xf32>
    %86 = vector.multi_reduction <add>, %85, %cst_63 [0] : vector<16x12xf32> to vector<12xf32>
    %87 = vector.shape_cast %86 : vector<12xf32> to vector<1x12xf32>
    %88 = arith.mulf %85, %85 : vector<16x12xf32>
    %cst_64 = arith.constant dense<0.000000e+00> : vector<12xf32>
    %89 = vector.multi_reduction <add>, %88, %cst_64 [0] : vector<16x12xf32> to vector<12xf32>
    %90 = vector.shape_cast %89 : vector<12xf32> to vector<1x12xf32>
    %c0_65 = arith.constant 0 : index
    %c0_66 = arith.constant 0 : index
    %91 = vector.load %arg12[%c0_65, %c0_66] : memref<12x3xf32, #tpu.memory_space<vmem>>, vector<12x3xf32>
    %cst_67 = arith.constant dense<0.000000e+00> : vector<1x3xf32>
    %92 = tpu.matmul %87, %91, %cst_67 {dimension_numbers = #tpu.dot_dimension_numbers<[1], [0], [0], [1], [0, 0, 1, 1], [], []>} : vector<1x12xf32>, vector<12x3xf32>, vector<1x3xf32> -> vector<1x3xf32>
    %cst_68 = arith.constant 1.562500e-02 : f32
    %93 = vector.broadcast %cst_68 : f32 to vector<1x3xf32>
    %94 = arith.mulf %92, %93 : vector<1x3xf32>
    %c0_69 = arith.constant 0 : index
    %c0_70 = arith.constant 0 : index
    %95 = vector.load %arg12[%c0_69, %c0_70] : memref<12x3xf32, #tpu.memory_space<vmem>>, vector<12x3xf32>
    %cst_71 = arith.constant dense<0.000000e+00> : vector<1x3xf32>
    %96 = tpu.matmul %90, %95, %cst_71 {dimension_numbers = #tpu.dot_dimension_numbers<[1], [0], [0], [1], [0, 0, 1, 1], [], []>} : vector<1x12xf32>, vector<12x3xf32>, vector<1x3xf32> -> vector<1x3xf32>
    %cst_72 = arith.constant 1.562500e-02 : f32
    %97 = vector.broadcast %cst_72 : f32 to vector<1x3xf32>
    %98 = arith.mulf %96, %97 : vector<1x3xf32>
    %99 = arith.mulf %94, %94 : vector<1x3xf32>
    %100 = arith.subf %98, %99 : vector<1x3xf32>
    %c0_73 = arith.constant 0 : index
    %c0_74 = arith.constant 0 : index
    %101 = vector.load %arg14[%c0_73, %c0_74] : memref<1x3xf32, #tpu.memory_space<vmem>>, vector<1x3xf32>
    %cst_75 = arith.constant 9.99999974E-6 : f32
    %102 = vector.broadcast %cst_75 : f32 to vector<1x3xf32>
    %103 = arith.addf %100, %102 : vector<1x3xf32>
    %104 = math.rsqrt %103 : vector<1x3xf32>
    %105 = arith.mulf %101, %104 : vector<1x3xf32>
    %c0_76 = arith.constant 0 : index
    %c0_77 = arith.constant 0 : index
    %106 = vector.load %arg15[%c0_76, %c0_77] : memref<1x3xf32, #tpu.memory_space<vmem>>, vector<1x3xf32>
    %107 = arith.mulf %94, %105 : vector<1x3xf32>
    %108 = arith.subf %106, %107 : vector<1x3xf32>
    %c0_78 = arith.constant 0 : index
    %c0_79 = arith.constant 0 : index
    %109 = vector.load %arg13[%c0_78, %c0_79] : memref<3x12xf32, #tpu.memory_space<vmem>>, vector<3x12xf32>
    %cst_80 = arith.constant dense<0.000000e+00> : vector<1x12xf32>
    %110 = tpu.matmul %105, %109, %cst_80 {dimension_numbers = #tpu.dot_dimension_numbers<[1], [0], [0], [1], [0, 0, 1, 1], [], []>} : vector<1x3xf32>, vector<3x12xf32>, vector<1x12xf32> -> vector<1x12xf32>
    %c0_81 = arith.constant 0 : index
    %c0_82 = arith.constant 0 : index
    %111 = vector.load %arg13[%c0_81, %c0_82] : memref<3x12xf32, #tpu.memory_space<vmem>>, vector<3x12xf32>
    %cst_83 = arith.constant dense<0.000000e+00> : vector<1x12xf32>
    %112 = tpu.matmul %108, %111, %cst_83 {dimension_numbers = #tpu.dot_dimension_numbers<[1], [0], [0], [1], [0, 0, 1, 1], [], []>} : vector<1x3xf32>, vector<3x12xf32>, vector<1x12xf32> -> vector<1x12xf32>
    %113 = vector.broadcast %110 : vector<1x12xf32> to vector<16x12xf32>
    %114 = arith.mulf %85, %113 : vector<16x12xf32>
    %115 = vector.broadcast %112 : vector<1x12xf32> to vector<16x12xf32>
    %116 = arith.addf %114, %115 : vector<16x12xf32>
    %cst_84 = arith.constant 0.000000e+00 : f32
    %117 = vector.broadcast %cst_84 : f32 to vector<16x12xf32>
    %118 = arith.maximumf %116, %117 : vector<16x12xf32>
    %c0_85 = arith.constant 0 : index
    %c0_86 = arith.constant 0 : index
    %119 = vector.load %arg16[%c0_85, %c0_86] : memref<12x10xf32, #tpu.memory_space<vmem>>, vector<12x10xf32>
    %cst_87 = arith.constant dense<0.000000e+00> : vector<16x10xf32>
    %120 = tpu.matmul %118, %119, %cst_87 {dimension_numbers = #tpu.dot_dimension_numbers<[1], [0], [0], [1], [0, 0, 1, 1], [], []>} : vector<16x12xf32>, vector<12x10xf32>, vector<16x10xf32> -> vector<16x10xf32>
    %c0_88 = arith.constant 0 : index
    %c0_89 = arith.constant 0 : index
    %121 = vector.load %arg17[%c0_88, %c0_89] : memref<1x10xf32, #tpu.memory_space<vmem>>, vector<1x10xf32>
    %122 = vector.broadcast %121 : vector<1x10xf32> to vector<16x10xf32>
    %123 = arith.addf %120, %122 : vector<16x10xf32>
    %c0_90 = arith.constant 0 : index
    %c0_91 = arith.constant 0 : index
    %124 = vector.load %arg18[%c0_90, %c0_91] : memref<16x10xf32, #tpu.memory_space<vmem>>, vector<16x10xf32>
    tpu.vector_store %arg18[%c0_90, %c0_91], %123 {strides = array<i32>} : memref<16x10xf32, #tpu.memory_space<vmem>>, vector<16x10xf32>,
    return
  }
}

</mosaic_0001>

<bundles_post_ra>
// kernel: digits_convnet_forward.1
= control target key start
LH: loop header
LB: loop body
LE: loop exit
PB: predicated region body
PF: predicated region fallthrough
CT: control target
= control target key end

     0   :  { %s3681_s0 = inlined_call_operand.vmem [shape: f32[16,64], index: 0, kind: input, shape index: {}]   ;;  %s3682_s1 = inlined_call_operand.vmem [shape: f32[64,252], index: 1, kind: input, shape index: {}]   ;;  %s3683_s2 = inlined_call_operand.vmem [shape: f32[252,7], index: 2, kind: input, shape index: {}]   ;;  %s3684_s3 = inlined_call_operand.vmem [shape: f32[7,252], index: 3, kind: input, shape index: {}]   ;;  %s3685_s4 = inlined_call_operand.vmem [shape: f32[1,7], index: 4, kind: input, shape index: {}]   ;;  %s3686_s5 = inlined_call_operand.vmem [shape: f32[1,7], index: 5, kind: input, shape index: {}]   ;;  %s3687_s6 = inlined_call_operand.vmem [shape: f32[4,252,63], index: 6, kind: input, shape index: {}]   ;;  %s3688_s7 = inlined_call_operand.vmem [shape: f32[63,7], index: 7, kind: input, shape index: {}]   ;;  %s3689_s8 = inlined_call_operand.vmem [shape: f32[7,63], index: 8, kind: input, shape index: {}]   ;;  %s3690_s9 = inlined_call_operand.vmem [shape: f32[1,7], index: 9, kind: input, shape index: {}]   ;;  %s3691_s10 = inlined_call_operand.vmem [shape: f32[1,7], index: 10, kind: input, shape index: {}]   ;;  %s3692_s11 = inlined_call_operand.vmem [shape: f32[63,12], index: 11, kind: input, shape index: {}]   ;;  %s3693_s12 = inlined_call_operand.vmem [shape: f32[12,3], index: 12, kind: input, shape index: {}]   ;;  %s3694_s13 = inlined_call_operand.vmem [shape: f32[3,12], index: 13, kind: input, shape index: {}]   ;;  %s3695_s14 = inlined_call_operand.vmem [shape: f32[1,3], index: 14, kind: input, shape index: {}]   ;;  %s3696_s15 = inlined_call_operand.vmem [shape: f32[1,3], index: 15, kind: input, shape index: {}]   ;;  %s3697_s16 = inlined_call_operand.vmem [shape: f32[12,10], index: 16, kind: input, shape index: {}]   ;;  %s3698_s17 = inlined_call_operand.vmem [shape: f32[1,10], index: 17, kind: input, shape index: {}]   ;;  %s3699_s18 = inlined_call_operand.hbm [shape: f32[16,10], index: 18, kind: output, shape index: {}]  }
   0x1   :  { %3703 = sst [smem:[#allocation5_spill]] %s3681_s0 }
   0x2   :  { %3704 = sst [smem:[#allocation6_spill]] %s3682_s1 }
   0x3   :  { %3705 = sst [smem:[#allocation7_spill]] %s3683_s2 }
   0x4   :  { %s3706_s29 = sld [smem:[#allocation6_spill]]  ;;  %v2757_v7 = vmov 0.0   ;;  %s3707_s30 = sld [smem:[#allocation7_spill]] }
   0x5   :  { %149 = vmatprep.mubr.f32.mxu0 %v2757_v7 }
   0xa   :  { %v63_v0 = vld [vmem:[%s3706_s29 + $0x8] sm:$0xff]  ;;  %v65_v1 = vld [vmem:[%s3706_s29 + $0x18] sm:$0xff]  ;;  %v62_v2 = vld [vmem:[%s3706_s29] sm:$0xff] }
   0xb   :  { %v2448_v3 = vpack.c.bf16 %v65_v1, %v63_v0  ;;  %v64_v4 = vld [vmem:[%s3706_s29 + $0x10] sm:$0xff]  ;;  %v67_v5 = vld [vmem:[%s3706_s29 + $0x28] sm:$0xff]  ;;  %v69_v6 = vld [vmem:[%s3706_s29 + $0x38] sm:$0xff] }
   0xc   :  { %v2450_v8 = vpack.c.bf16 %v64_v4, %v62_v2  ;;  %v2452_v9 = vpack.c.bf16 %v69_v6, %v67_v5  ;;  %v66_v10 = vld [vmem:[%s3706_s29 + $0x20] sm:$0xff]  ;;  %v68_v11 = vld [vmem:[%s3706_s29 + $0x30] sm:$0xff]  ;;  %v71_v12 = vld [vmem:[%s3706_s29 + $0x48] sm:$0xff] }
   0xd   :  { %2449 = vmatprep.subr.bf16.mxu0 %v2448_v3  ;;  %v73_v13 = vld [vmem:[%s3706_s29 + $0x58] sm:$0xff]  ;;  %v2454_v14 = vpack.c.bf16 %v68_v11, %v66_v10  ;;  %v70_v15 = vld [vmem:[%s3706_s29 + $0x40] sm:$0xff]  ;;  %v72_v17 = vld [vmem:[%s3706_s29 + $0x50] sm:$0xff] }
   0xe   :  { %2451 = vmatpush1.bf16.msra.mxu0 %v2450_v8  ;;  %v2456_v16 = vpack.c.bf16 %v73_v13, %v71_v12  ;;  %v75_v18 = vld [vmem:[%s3706_s29 + $0x68] sm:$0xff]  ;;  %v77_v19 = vld [vmem:[%s3706_s29 + $0x78] sm:$0xff]  ;;  %v215_v20 = vld [vmem:[%s3707_s30 + $0x80] sm:$0xff]  ;;  %v2458_v27 = vpack.c.bf16 %v72_v17, %v70_v15 }
   0xf   :  { %2453 = vmatprep.subr.bf16.mxu0 %v2452_v9  ;;  %v216_v21 = vld [vmem:[%s3707_s30 + $0x88] sm:$0xff]  ;;  %v199_v22 = vld [vmem:[%s3707_s30] sm:$0xff]  ;;  %v217_v25 = vld [vmem:[%s3707_s30 + $0x90] sm:$0xff]  ;;  %v2460_v33 = vpack.c.bf16 %v77_v19, %v75_v18 }
  0x10   :  { %v2464_v23 = vpack.c.bf16 %v216_v21, %v215_v20  ;;  %v200_v24 = vld [vmem:[%s3707_s30 + $0x8] sm:$0xff]  ;;  %v218_v26 = vld [vmem:[%s3707_s30 + $0x98] sm:$0xff]  ;;  %v201_v30 = vld [vmem:[%s3707_s30 + $0x10] sm:$0xff] }
  0x11   :  { %v2466_v28 = vpack.c.bf16 %v200_v24, %v199_v22  ;;  %v2468_v29 = vpack.c.bf16 %v218_v26, %v217_v25  ;;  %v202_v31 = vld [vmem:[%s3707_s30 + $0x18] sm:$0xff]  ;;  %v219_v32 = vld [vmem:[%s3707_s30 + $0xa0] sm:$0xff]  ;;  %v76_v35 = vld [vmem:[%s3706_s29 + $0x70] sm:$0xff] }
  0x12   :  { %2455 = vmatpush1.bf16.msra.mxu0 %v2454_v14  ;;  %v74_v34 = vld [vmem:[%s3706_s29 + $0x60] sm:$0xff]  ;;  %2465 = vmatprep.subr.bf16.mxu1 %v2464_v23  ;;  %v220_v36 = vld [vmem:[%s3707_s30 + $0xa8] sm:$0xff]  ;;  %v2470_v37 = vpack.c.bf16 %v202_v31, %v201_v30 }
  0x13   :  { %2457 = vmatprep.subr.bf16.mxu0 %v2456_v16  ;;  %2467 = vmatpush3.bf16.msra.mxu1 %v2466_v28 }
  0x14   :  { %23 = vsyncpa [#allocation3], 0  ;;  %2469 = vmatprep.subr.bf16.mxu1 %v2468_v29  ;;  %v2472_v38 = vpack.c.bf16 %v220_v36, %v219_v32  ;;  %v203_v39 = vld [vmem:[%s3707_s30 + $0x20] sm:$0xff]  ;;  %v204_v40 = vld [vmem:[%s3707_s30 + $0x28] sm:$0xff]  ;;  %v2462_v41 = vpack.c.bf16 %v76_v35, %v74_v34  ;;  %s3708_s19 = sld [smem:[#allocation5_spill]]  ;;  %vm78_vm0 = vcmask 523264  }
  0x15   :  { %v2474_v42 = vpack.c.bf16 %v204_v40, %v203_v39  ;;  %v221_v45 = vld [vmem:[%s3707_s30 + $0xb0] sm:$0xff]  ;;  %v222_v46 = vld [vmem:[%s3707_s30 + $0xb8] sm:$0xff]  ;;  %v223_v51 = vld [vmem:[%s3707_s30 + $0xc0] sm:$0xff]  ;;  %vm234_vm1 = vcmask 1043456   ;;  %vm2758_vm2 = vmmov 1   ;;  %vm169_vm4 = vcmask 1014784  }
  0x16   :  { %2459 = vmatpush1.bf16.msra.mxu0 %v2458_v27  ;;  %v2476_v47 = vpack.c.bf16 %v222_v46, %v221_v45  ;;  %v205_v48 = vld [vmem:[%s3707_s30 + $0x30] sm:$0xff]  ;;  %v206_v49 = vld [vmem:[%s3707_s30 + $0x38] sm:$0xff]  ;;  %v224_v52 = vld [vmem:[%s3707_s30 + $0xc8] sm:$0xff]  ;;  %vm398_vm5 = vcmask 1046528   ;;  %vm394_vm6 = vcmask 56320   ;;  %vm2760_vm8 = vmmov 0  }
  0x17   :  { %2461 = vmatprep.subr.bf16.mxu0 %v2460_v33  ;;  %2471 = vmatpush3.bf16.msra.mxu1 %v2470_v37  ;;  %v2478_v50 = vpack.c.bf16 %v206_v49, %v205_v48  ;;  %v2480_v53 = vpack.c.bf16 %v224_v52, %v223_v51  ;;  %v207_v54 = vld [vmem:[%s3707_s30 + $0x40] sm:$0xff]  ;;  %v208_v55 = vld [vmem:[%s3707_s30 + $0x48] sm:$0xff]  ;;  %v225_v57 = vld [vmem:[%s3707_s30 + $0xd0] sm:$0xff]  ;;  %vm1033_vm9 = vcmask 515072   ;;  %vm1478_vm10 = vcmask 97280   ;;  %s2761_s21 = smov [#allocation2]  }
  0x18   :  { %2473 = vmatprep.subr.bf16.mxu1 %v2472_v38  ;;  %v2482_v56 = vpack.c.bf16 %v208_v55, %v207_v54  ;;  %v226_v58 = vld [vmem:[%s3707_s30 + $0xd8] sm:$0xff]  ;;  %v209_v60 = vld [vmem:[%s3707_s30 + $0x50] sm:$0xff]  ;;  %v227_v63 = vld [vmem:[%s3707_s30 + $0xe0] sm:$0xff]  ;;  %vm1666_vm11 = vcmask 1042432   ;;  %vm1662_vm12 = vcmask 23552   ;;  %vm1920_vm13 = vcmask 80896  }
  0x19   :  { %v2484_v59 = vpack.c.bf16 %v226_v58, %v225_v57  ;;  %v210_v61 = vld [vmem:[%s3707_s30 + $0x58] sm:$0xff]  ;;  %v228_v0 = vld [vmem:[%s3707_s30 + $0xe8] sm:$0xff]  ;;  %v211_v2 = vld [vmem:[%s3707_s30 + $0x60] sm:$0xff] }
  0x1a   :  { %2463 = vmatpush1.bf16.msra.mxu0 %v2462_v41  ;;  %v60_v43 = vld [vmem:[%s3708_s19] sm:$0xff]  ;;  %v61_v44 = vld [vmem:[%s3708_s19 + $0x8] sm:$0xff]  ;;  %v2486_v62 = vpack.c.bf16 %v210_v61, %v209_v60  ;;  %v2488_v1 = vpack.c.bf16 %v228_v0, %v227_v63  ;;  %v229_v5 = vld [vmem:[%s3707_s30 + $0xf0] sm:$0xff] }
  0x1b   :  { %2498 = vmatprep.subr.bf16.mxu0 %v2464_v23  ;;  %2475 = vmatpush3.bf16.msra.mxu1 %v2474_v42  ;;  %v212_v3 = vld [vmem:[%s3707_s30 + $0x68] sm:$0xff]  ;;  %v230_v6 = vld [vmem:[%s3707_s30 + $0xf8] sm:$0xf]  ;;  %v213_v9 = vld [vmem:[%s3707_s30 + $0x70] sm:$0xff] }
  0x1c   :  { %2477 = vmatprep.subr.bf16.mxu1 %v2476_v47  ;;  %v2490_v4 = vpack.c.bf16 %v212_v3, %v211_v2  ;;  %v2492_v8 = vpack.c.bf16 %v230_v6, %v229_v5  ;;  %v214_v10 = vld [vmem:[%s3707_s30 + $0x78] sm:$0xff]  ;;  %vm3012_vm3 = vmpackc.low %vm234_vm1, %vm2758_vm2  ;;  %v3053_v54 = vld [vmem:[%s3684_s3] sm:$0x7f] }
  0x1d   :  { %1939 = vmatmul.mubr.msk.f32.vlgmr.msra.gmra.mrb[0].mxu0 %vm78_vm0, %v60_v43  ;;  %v2495_v12 = vpack.c.bf16 %v214_v10, %v213_v9  ;;  %v1970_v55 = vld [vmem:[%s3687_s6 + $0x180] sm:$0xff]  ;;  %v1972_v61 = vld [vmem:[%s3687_s6 + $0x190] sm:$0xff]  ;;  %vm3532_vm7 = vmpackc.low %vm398_vm5, %vm2758_vm2 }
  0x1e   :  { %155 = vmatprep.mubr.f32.mxu0 %v2757_v7  ;;  %2500 = vmatpush3.bf16.msra.mxu0 %v2466_v28  ;;  %v1954_v58 = vld [vmem:[%s3687_s6 + $0x100] sm:$0xff]  ;;  %v1956_v0 = vld [vmem:[%s3687_s6 + $0x110] sm:$0xff] }
  0x1f   :  { %2502 = vmatprep.subr.bf16.mxu0 %v2468_v29  ;;  %2479 = vmatpush3.bf16.msra.mxu1 %v2478_v50  ;;  %v1974_v3 = vld [vmem:[%s3687_s6 + $0x1a0] sm:$0xff]  ;;  %v1976_v10 = vld [vmem:[%s3687_s6 + $0x1b0] sm:$0xff] }
  0x20   :  { %2481 = vmatprep.subr.bf16.mxu1 %v2480_v53  ;;  %v1958_v6 = vld [vmem:[%s3687_s6 + $0x120] sm:$0xff] }
  0x21   :  { %1940 = vmatmul.mubr.msk.f32.gmra.mrb[2].mxu0 %vm78_vm0, %v61_v44  ;;  %v2078_v11 = vld [vmem:[%s3698_s17] ss:$0 sm:$0xff] }
  0x22   :  { %2504 = vmatpush3.bf16.msra.mxu0 %v2470_v37 }
  0x23   :  { %2506 = vmatprep.subr.bf16.mxu0 %v2472_v38  ;;  %2483 = vmatpush3.bf16.msra.mxu1 %v2482_v56 }
  0x24   :  { %2485 = vmatprep.subr.bf16.mxu1 %v2484_v59 }
  0x26   :  { %2508 = vmatpush3.bf16.msra.mxu0 %v2474_v42 }
  0x27   :  { %2510 = vmatprep.subr.bf16.mxu0 %v2476_v47  ;;  %2487 = vmatpush3.bf16.msra.mxu1 %v2486_v62 }
  0x28   :  { %2489 = vmatprep.subr.bf16.mxu1 %v2488_v1 }
  0x2a   :  { %2512 = vmatpush3.bf16.msra.mxu0 %v2478_v50 }
  0x2b   :  { %2514 = vmatprep.subr.bf16.mxu0 %v2480_v53  ;;  %2491 = vmatpush3.bf16.msra.mxu1 %v2490_v4  ;;  %v393_v53 = vld [vmem:[%s3684_s3 + $0x8] sm:$0x7f] }
  0x2c   :  { %2494 = vmatprep.subr.msk.bf16.mxu1 %vm3012_vm3, %v2492_v8 }
  0x2e   :  { %2516 = vmatpush3.bf16.msra.mxu0 %v2482_v56  ;;  %v1971_v56 = vld [vmem:[%s3687_s6 + $0x188] sm:$0xff] }
  0x2f   :  { %2518 = vmatprep.subr.bf16.mxu0 %v2484_v59  ;;  %2496 = vmatpush3.bf16.msra.mxu1 %v2495_v12  ;;  %v2563_v57 = vpack.c.bf16 %v1971_v56, %v1970_v55  ;;  %v1955_v59 = vld [vmem:[%s3687_s6 + $0x108] sm:$0xff]  ;;  %v581_v55 = vld [vmem:[%s3687_s6 + $0x18] sm:$0xff]  ;;  %v598_v56 = vld [vmem:[%s3687_s6 + $0xa0] sm:$0xff] }
  0x30   :  { %1945 = vmatprep.subr.msk.mxu1 %vm398_vm5, %v393_v53  ;;  %v2565_v60 = vpack.c.bf16 %v1955_v59, %v1954_v58  ;;  %v582_v59 = vld [vmem:[%s3687_s6 + $0x20] sm:$0xff] }
  0x32   :  { %2520 = vmatpush3.bf16.msra.mxu0 %v2486_v62  ;;  %v1973_v62 = vld [vmem:[%s3687_s6 + $0x198] sm:$0xff] }
  0x33   :  { %2522 = vmatprep.subr.bf16.mxu0 %v2488_v1  ;;  %v2567_v63 = vpack.c.bf16 %v1973_v62, %v1972_v61  ;;  %v1957_v1 = vld [vmem:[%s3687_s6 + $0x118] sm:$0xff]  ;;  %v600_v61 = vld [vmem:[%s3687_s6 + $0xb0] sm:$0xff] }
  0x34   :  { %v2569_v2 = vpack.c.bf16 %v1957_v1, %v1956_v0  ;;  %v601_v62 = vld [vmem:[%s3687_s6 + $0xb8] sm:$0xff]  ;;  %v584_v1 = vld [vmem:[%s3687_s6 + $0x30] sm:$0xff] }
  0x35   :  { %v2542_v0 = vpack.c.bf16 %v601_v62, %v600_v61 }
  0x36   :  { %2524 = vmatpush3.bf16.msra.mxu0 %v2490_v4  ;;  %v1975_v4 = vld [vmem:[%s3687_s6 + $0x1a8] sm:$0xff] }
  0x37   :  { %2527 = vmatprep.subr.msk.bf16.mxu0 %vm3012_vm3, %v2492_v8  ;;  %v2571_v5 = vpack.c.bf16 %v1975_v4, %v1974_v3  ;;  %v1959_v8 = vld [vmem:[%s3687_s6 + $0x128] sm:$0xff]  ;;  %v602_v3 = vld [vmem:[%s3687_s6 + $0xc0] sm:$0xff] }
  0x38   :  { %v2573_v9 = vpack.c.bf16 %v1959_v8, %v1958_v6  ;;  %v603_v4 = vld [vmem:[%s3687_s6 + $0xc8] sm:$0xff]  ;;  %v586_v8 = vld [vmem:[%s3687_s6 + $0x40] sm:$0xff] }
  0x39   :  { %v2546_v6 = vpack.c.bf16 %v603_v4, %v602_v3 }
  0x3a   :  { %2529 = vmatpush3.bf16.msra.mxu0 %v2495_v12  ;;  %v1977_v12 = vld [vmem:[%s3687_s6 + $0x1b8] sm:$0xff] }
  0x3b   :  { %2564 = vmatprep.subr.bf16.mxu0 %v2563_v57 }
  0xf0   :  { %v3020_v13 = vpop.f32.mrb[0].mxu0 }
  0xf1   :  { %v3022_v14 = vpop.f32.mrb[1].mxu0  ;;  %v179_v17 = vmul.f32 %v3020_v13, %v3020_v13 }
  0xf2   :  { %v180_v15 = vmul.f32 %v3022_v14, %v3022_v14  ;;  %v170_v21 = vsel %vm169_vm4, %v3022_v14, 0.0 }
  0xf4   :  { %v3026_v16 = vpop.f32.mrb[2].mxu0  ;;  %v190_v27 = vsel %vm169_vm4, %v180_v15, 0.0  ;;  %v2575_v15 = vpack.c.bf16 %v1977_v12, %v1976_v10  ;;  %v604_v12 = vld [vmem:[%s3687_s6 + $0xd0] sm:$0xff] }
  0xf5   :  { %v162_v18 = vadd.f32 %v3026_v16, %v3020_v13  ;;  %v181_v19 = vmul.f32 %v3026_v16, %v3026_v16  ;;  %v3034_v20 = vpop.f32.mrb[3].mxu0 }
  0xf6   :  { %v171_v22 = vsel %vm169_vm4, %v3034_v20, 0.0  ;;  %v182_v23 = vmul.f32 %v3034_v20, %v3034_v20 }
  0xf7   :  { %v163_v24 = vrot.slane %v162_v18, 4  ;;  %v183_v25 = vadd.f32 %v181_v19, %v179_v17  ;;  %v172_v26 = vadd.f32 %v171_v22, %v170_v21  ;;  %v1960_v17 = vld [vmem:[%s3687_s6 + $0x130] sm:$0xff]  ;;  %v1978_v21 = vld [vmem:[%s3687_s6 + $0x1c0] sm:$0xff]  ;;  %v1979_v22 = vld [vmem:[%s3687_s6 + $0x1c8] sm:$0xff] }
  0xf8   :  { %v191_v28 = vsel %vm169_vm4, %v182_v23, 0.0  ;;  %v2579_v23 = vpack.c.bf16 %v1979_v22, %v1978_v21  ;;  %v588_v21 = vld [vmem:[%s3687_s6 + $0x50] sm:$0xff]  ;;  %v589_v22 = vld [vmem:[%s3687_s6 + $0x58] sm:$0xff] }
  0xf9   :  { %v164_v29 = vadd.f32 %v163_v24, %v162_v18  ;;  %v184_v30 = vrot.slane %v183_v25, 4  ;;  %v173_v31 = vrot.slane %v172_v26, 4  ;;  %v192_v32 = vadd.f32 %v191_v28, %v190_v27  ;;  %v1961_v18 = vld [vmem:[%s3687_s6 + $0x138] sm:$0xff]  ;;  %v1962_v24 = vld [vmem:[%s3687_s6 + $0x140] sm:$0xff] }
  0xfa   :  { %v2577_v19 = vpack.c.bf16 %v1961_v18, %v1960_v17  ;;  %v1980_v17 = vld [vmem:[%s3687_s6 + $0x1d0] sm:$0xff] }
  0xfb   :  { %v165_v33 = vrot.slane %v164_v29, 2  ;;  %v185_v34 = vadd.f32 %v184_v30, %v183_v25  ;;  %v193_v35 = vrot.slane %v192_v32, 4  ;;  %v174_v36 = vadd.f32 %v173_v31, %v172_v26  ;;  %v1963_v25 = vld [vmem:[%s3687_s6 + $0x148] sm:$0xff] }
  0xfc   :  { %v2581_v26 = vpack.c.bf16 %v1963_v25, %v1962_v24  ;;  %v2552_v24 = vpack.c.bf16 %v589_v22, %v588_v21  ;;  %v1964_v25 = vld [vmem:[%s3687_s6 + $0x150] sm:$0xff]  ;;  %v2043_v22 = vld [vmem:[%s3687_s6 + $0x398] sm:$0xff] }
  0xfd   :  { %v186_v37 = vrot.slane %v185_v34, 2  ;;  %v194_v38 = vadd.f32 %v193_v35, %v192_v32  ;;  %v175_v39 = vrot.slane %v174_v36, 2  ;;  %v166_v40 = vadd.f32 %v165_v33, %v164_v29  ;;  %v2042_v21 = vld [vmem:[%s3687_s6 + $0x390] sm:$0xff] }
  0xff   :  { %v187_v41 = vadd.f32 %v186_v37, %v185_v34  ;;  %v195_v42 = vrot.slane %v194_v38, 2  ;;  %v176_v43 = vadd.f32 %v175_v39, %v174_v36  ;;  %v167_v44 = vrot.slane %v166_v40, 1  ;;  %v594_v39 = vld [vmem:[%s3687_s6 + $0x80] sm:$0xff] }
 0x101   :  { %v177_v45 = vrot.slane %v176_v43, 1  ;;  %v196_v46 = vadd.f32 %v195_v42, %v194_v38  ;;  %v188_v47 = vrot.slane %v187_v41, 1  ;;  %v168_v50 = vadd.f32 %v167_v44, %v166_v40  ;;  %v385_v38 = vld [vmem:[%s3685_s4] sm:$0x1]  ;;  %v595_v40 = vld [vmem:[%s3687_s6 + $0x88] sm:$0xff] }
 0x102   :  { %v578_v44 = vld [vmem:[%s3687_s6] sm:$0xff] }
 0x103   :  { %v178_v48 = vadd.f32 %v177_v45, %v176_v43  ;;  %v197_v49 = vrot.slane %v196_v46, 1  ;;  %v189_v52 = vadd.f32 %v188_v47, %v187_v41  ;;  %v2530_v43 = vpack.c.bf16 %v595_v40, %v594_v39  ;;  %v579_v45 = vld [vmem:[%s3687_s6 + $0x8] sm:$0xff]  ;;  %v596_v47 = vld [vmem:[%s3687_s6 + $0x90] sm:$0xff] }
 0x104   :  { %v608_v40 = vld [vmem:[%s3687_s6 + $0xf0] sm:$0xff] }
 0x105   :  { %1942 = vmatprep.mubr.msk.f32.mxu1 %vm169_vm4, %v178_v48  ;;  %v198_v51 = vadd.f32 %v197_v49, %v196_v46  ;;  %v389_v46 = vld [vmem:[%s3686_s5] sm:$0x1]  ;;  %v597_v48 = vld [vmem:[%s3687_s6 + $0x98] sm:$0xff] }
 0x106   :  { %303 = vmatmul.mubr.f32.vlgmr.msra.gmra.mrb[0].mxu1 %v168_v50  ;;  %v2532_v50 = vpack.c.bf16 %v579_v45, %v578_v44  ;;  %v1985_v44 = vld [vmem:[%s3687_s6 + $0x1f8] sm:$0xf]  ;;  %v592_v45 = vld [vmem:[%s3687_s6 + $0x70] sm:$0xff] }
 0x107   :  { %1944 = vmatprep.mubr.msk.f32.mxu0 %vm169_vm4, %v198_v51  ;;  %469 = vmatprep.mubr.f32.mxu1 %v2757_v7 }
 0x108   :  { %377 = vmatmul.mubr.f32.vlgmr.msra.gmra.mrb[4].mxu0 %v189_v52  ;;  %1946 = vmatpush1.msk.msra.mxu1 %vm398_vm5, %v3053_v54  ;;  %v2534_v52 = vpack.c.bf16 %v597_v48, %v596_v47 }
 0x109   :  { %1948 = vmatprep.subr.msk.mxu1 %vm398_vm5, %v393_v53  ;;  %2566 = vmatpush3.bf16.msra.mxu0 %v2565_v60  ;;  %v580_v53 = vld [vmem:[%s3687_s6 + $0x10] sm:$0xff]  ;;  %v583_v60 = vld [vmem:[%s3687_s6 + $0x28] sm:$0xff] }
 0x10a   :  { %2568 = vmatprep.subr.bf16.mxu0 %v2567_v63  ;;  %v2536_v57 = vpack.c.bf16 %v581_v55, %v580_v53  ;;  %v2540_v63 = vpack.c.bf16 %v583_v60, %v582_v59  ;;  %v2006_v53 = vld [vmem:[%s3687_s6 + $0x288] sm:$0xff]  ;;  %v2040_v55 = vld [vmem:[%s3687_s6 + $0x380] sm:$0xff] }
 0x10d   :  { %2570 = vmatpush3.bf16.msra.mxu0 %v2569_v2  ;;  %v585_v2 = vld [vmem:[%s3687_s6 + $0x38] sm:$0xff] }
 0x10e   :  { %2572 = vmatprep.subr.bf16.mxu0 %v2571_v5  ;;  %v2544_v5 = vpack.c.bf16 %v585_v2, %v584_v1 }
 0x111   :  { %2574 = vmatpush3.bf16.msra.mxu0 %v2573_v9  ;;  %v587_v9 = vld [vmem:[%s3687_s6 + $0x48] sm:$0xff] }
 0x112   :  { %2576 = vmatprep.subr.bf16.mxu0 %v2575_v15  ;;  %v2548_v10 = vpack.c.bf16 %v587_v9, %v586_v8  ;;  %v605_v15 = vld [vmem:[%s3687_s6 + $0xd8] sm:$0xff] }
 0x113   :  { %v2550_v18 = vpack.c.bf16 %v605_v15, %v604_v12 }
 0x115   :  { %2578 = vmatpush3.bf16.msra.mxu0 %v2577_v19  ;;  %v1981_v19 = vld [vmem:[%s3687_s6 + $0x1d8] sm:$0xff] }
 0x116   :  { %2580 = vmatprep.subr.bf16.mxu0 %v2579_v23  ;;  %v2583_v23 = vpack.c.bf16 %v1981_v19, %v1980_v17  ;;  %v2008_v19 = vld [vmem:[%s3687_s6 + $0x298] sm:$0xff] }
 0x119   :  { %2582 = vmatpush3.bf16.msra.mxu0 %v2581_v26  ;;  %v1965_v26 = vld [vmem:[%s3687_s6 + $0x158] sm:$0xff] }
 0x11a   :  { %2584 = vmatprep.subr.bf16.mxu0 %v2583_v23 }
 0x1d9   :  { %v2114_v27 = vpop.f32.mrb[0].mxu1 }
 0x1da   :  { %v2115_v28 = vpop.f32.mrb[1].mxu1 }
 0x1db   :  { %v2116_v29 = vadd.f32 %v2115_v28, %v2114_v27  ;;  %v2149_v30 = vpop.f32.mrb[4].mxu0  ;;  %v2585_v27 = vpack.c.bf16 %v1965_v26, %v1964_v25  ;;  %v606_v28 = vld [vmem:[%s3687_s6 + $0xe0] sm:$0xff]  ;;  %v1991_v26 = vld [vmem:[%s3687_s6 + $0x210] sm:$0xff] }
 0x1dc   :  { %v2150_v31 = vpop.f32.mrb[5].mxu0 }
 0x1dd   :  { %v308_v32 = vmul.f32 0.0017361111, %v2116_v29  ;;  %v2151_v33 = vadd.f32 %v2150_v31, %v2149_v30  ;;  %v607_v29 = vld [vmem:[%s3687_s6 + $0xe8] sm:$0xff]  ;;  %v1982_v30 = vld [vmem:[%s3687_s6 + $0x1e0] sm:$0xff]  ;;  %2586 = vmatpush3.bf16.msra.mxu0 %v2585_v27 }
 0x1de   :  { %v2554_v31 = vpack.c.bf16 %v607_v29, %v606_v28  ;;  %v1992_v28 = vld [vmem:[%s3687_s6 + $0x218] sm:$0xff]  ;;  %v2026_v29 = vld [vmem:[%s3687_s6 + $0x310] sm:$0xff] }
 0x1df   :  { %v383_v34 = vmul.f32 %v308_v32, %v308_v32  ;;  %v382_v35 = vmul.f32 0.0017361111, %v2151_v33  ;;  %v590_v33 = vld [vmem:[%s3687_s6 + $0x60] sm:$0xff] }
 0x1e1   :  { %v384_v36 = vsub.f32 %v382_v35, %v383_v34  ;;  %v591_v34 = vld [vmem:[%s3687_s6 + $0x68] sm:$0xff] }
 0x1e3   :  { %v386_v37 = vadd.f32 1e-05, %v384_v36  ;;  %v2556_v36 = vpack.c.bf16 %v591_v34, %v590_v33  ;;  %v2009_v33 = vld [vmem:[%s3687_s6 + $0x2a0] sm:$0xff] }
 0x1e5   :  { %2727 = vrsqrt.f32 %v386_v37  ;;  %v1966_v37 = vld [vmem:[%s3687_s6 + $0x160] sm:$0xff] }
 0x1ef   :  { %v2728_v41 = vpop.eup %2727 }
 0x1f0   :  { %v388_v42 = vmul.f32 %v2728_v41, %v385_v38  ;;  %v1967_v38 = vld [vmem:[%s3687_s6 + $0x168] sm:$0xff]  ;;  %v609_v41 = vld [vmem:[%s3687_s6 + $0xf8] sm:$0xf] }
 0x1f1   :  { %v2589_v39 = vpack.c.bf16 %v1967_v38, %v1966_v37  ;;  %v2045_v37 = vld [vmem:[%s3687_s6 + $0x3a8] sm:$0xff]  ;;  %v2602_v38 = vpack.c.bf16 %v1992_v28, %v1991_v26 }
 0x1f2   :  { %1947 = vmatmul.mubr.msk.f32.vlgmr.msra.gmra.mrb[2].mxu1 %vm394_vm6, %v388_v42  ;;  %v390_v49 = vmul.f32 %v388_v42, %v308_v32  ;;  %v1983_v32 = vld [vmem:[%s3687_s6 + $0x1e8] sm:$0xff]  ;;  %v1984_v42 = vld [vmem:[%s3687_s6 + $0x1f0] sm:$0xff] }
 0x1f3   :  { %1949 = vmatpush1.msk.msra.mxu1 %vm398_vm5, %v3053_v54  ;;  %543 = vmatprep.mubr.f32.mxu1 %v2757_v7  ;;  %v599_v54 = vld [vmem:[%s3687_s6 + $0xa8] sm:$0xff]  ;;  %v2587_v35 = vpack.c.bf16 %v1983_v32, %v1982_v30  ;;  %v2591_v47 = vpack.c.bf16 %v1985_v44, %v1984_v42  ;;  %v2027_v30 = vld [vmem:[%s3687_s6 + $0x318] sm:$0xff]  ;;  %v2633_v32 = vpack.c.bf16 %v2043_v22, %v2042_v21  ;;  %v2017_v22 = vld [vmem:[%s3687_s6 + $0x2e0] sm:$0xff] }
 0x1f4   :  { %v391_v51 = vsub.f32 %v389_v46, %v390_v49  ;;  %2531 = vmatprep.subr.bf16.mxu1 %v2530_v43  ;;  %v2538_v58 = vpack.c.bf16 %v599_v54, %v598_v56  ;;  %v2558_v43 = vpack.c.bf16 %v609_v41, %v608_v40  ;;  %v593_v46 = vld [vmem:[%s3687_s6 + $0x78] sm:$0xff]  ;;  %v1968_v49 = vld [vmem:[%s3687_s6 + $0x170] sm:$0xff]  ;;  %v2041_v54 = vld [vmem:[%s3687_s6 + $0x388] sm:$0xff] }
 0x1f5   :  { %2588 = vmatprep.subr.bf16.mxu0 %v2587_v35  ;;  %v2561_v48 = vpack.c.bf16 %v593_v46, %v592_v45  ;;  %v2010_v35 = vld [vmem:[%s3687_s6 + $0x2a8] sm:$0xff]  ;;  %v1993_v40 = vld [vmem:[%s3687_s6 + $0x220] sm:$0xff]  ;;  %v2011_v45 = vld [vmem:[%s3687_s6 + $0x2b0] sm:$0xff] }
 0x1f6   :  { %1950 = vmatmul.mubr.msk.f32.vlgmr.msra.gmra.mrb[4].mxu1 %vm394_vm6, %v391_v51  ;;  %2590 = vmatpush3.bf16.msra.mxu0 %v2589_v39  ;;  %v2635_v39 = vpack.c.bf16 %v2027_v30, %v2026_v29  ;;  %v1994_v41 = vld [vmem:[%s3687_s6 + $0x228] sm:$0xff]  ;;  %v2604_v46 = vpack.c.bf16 %v2010_v35, %v2009_v33  ;;  %v2035_v21 = vld [vmem:[%s3687_s6 + $0x358] sm:$0xff]  ;;  %v2001_v29 = vld [vmem:[%s3687_s6 + $0x260] sm:$0xff] }
 0x1f7   :  { %2533 = vmatpush3.bf16.msra.mxu1 %v2532_v50  ;;  %v1969_v50 = vld [vmem:[%s3687_s6 + $0x178] sm:$0xff]  ;;  %2593 = vmatprep.subr.msk.bf16.mxu0 %vm3012_vm3, %v2591_v47  ;;  %v2029_v44 = vld [vmem:[%s3687_s6 + $0x328] sm:$0xff]  ;;  %v2036_v33 = vld [vmem:[%s3687_s6 + $0x360] sm:$0xff] }
 0x1f8   :  { %2535 = vmatprep.subr.bf16.mxu1 %v2534_v52  ;;  %v2594_v51 = vpack.c.bf16 %v1969_v50, %v1968_v49  ;;  %v2005_v52 = vld [vmem:[%s3687_s6 + $0x280] sm:$0xff]  ;;  %v2046_v49 = vld [vmem:[%s3687_s6 + $0x3b0] sm:$0xff]  ;;  %v2047_v50 = vld [vmem:[%s3687_s6 + $0x3b8] sm:$0xff] }
 0x1f9   :  { %v2596_v56 = vpack.c.bf16 %v2006_v53, %v2005_v52  ;;  %v1995_v53 = vld [vmem:[%s3687_s6 + $0x230] sm:$0xff]  ;;  %v2002_v30 = vld [vmem:[%s3687_s6 + $0x268] sm:$0xff] }
 0x1fa   :  { %2595 = vmatpush3.bf16.msra.mxu0 %v2594_v51  ;;  %v2606_v51 = vpack.c.bf16 %v1994_v41, %v1993_v40  ;;  %v2037_v35 = vld [vmem:[%s3687_s6 + $0x368] sm:$0xff]  ;;  %v2622_v40 = vpack.c.bf16 %v2002_v30, %v2001_v29 }
 0x1fb   :  { %2537 = vmatpush3.bf16.msra.mxu1 %v2536_v57  ;;  %v2629_v57 = vpack.c.bf16 %v2041_v54, %v2040_v55  ;;  %v1996_v55 = vld [vmem:[%s3687_s6 + $0x238] sm:$0xff]  ;;  %v2641_v54 = vpack.c.bf16 %v2047_v50, %v2046_v49  ;;  %v2655_v41 = vpack.c.bf16 %v2037_v35, %v2036_v33 }
 0x1fc   :  { %2539 = vmatprep.subr.bf16.mxu1 %v2538_v58  ;;  %v550_v58 = vlaneseq }
 0x1fd   :  { %2630 = vmatprep.subr.bf16.mxu0 %v2629_v57  ;;  %v2030_v57 = vld [vmem:[%s3687_s6 + $0x330] sm:$0xff] }
 0x1fe   :  { %v551_v59 = vshrl.u32 %v550_v58, 7  ;;  %v2031_v58 = vld [vmem:[%s3687_s6 + $0x338] sm:$0xff] }
 0x1ff   :  { %2541 = vmatpush3.bf16.msra.mxu1 %v2540_v63 }
 0x200   :  { %2543 = vmatprep.subr.bf16.mxu1 %v2542_v0  ;;  %v3278_v60 = vsub.s32 0, %v551_v59  ;;  %v2013_v59 = vld [vmem:[%s3687_s6 + $0x2c0] sm:$0xff] }
 0x203   :  { %2545 = vmatpush3.bf16.msra.mxu1 %v2544_v5 }
 0x204   :  { %2547 = vmatprep.subr.bf16.mxu1 %v2546_v6 }
 0x207   :  { %2549 = vmatpush3.bf16.msra.mxu1 %v2548_v10  ;;  %v1989_v10 = vld [vmem:[%s3687_s6 + $0x200] sm:$0xff] }
 0x208   :  { %2551 = vmatprep.subr.bf16.mxu1 %v2550_v18  ;;  %v2007_v18 = vld [vmem:[%s3687_s6 + $0x290] sm:$0xff] }
 0x20b   :  { %2553 = vmatpush3.bf16.msra.mxu1 %v2552_v24 }
 0x20c   :  { %2555 = vmatprep.subr.bf16.mxu1 %v2554_v31  ;;  %v2600_v31 = vpack.c.bf16 %v2008_v19, %v2007_v18  ;;  %v2034_v19 = vld [vmem:[%s3687_s6 + $0x350] sm:$0xff] }
 0x20d   :  { %v2651_v28 = vpack.c.bf16 %v2035_v21, %v2034_v19 }
 0x20f   :  { %2557 = vmatpush3.bf16.msra.mxu1 %v2556_v36  ;;  %v2044_v36 = vld [vmem:[%s3687_s6 + $0x3a0] sm:$0xff] }
 0x210   :  { %2560 = vmatprep.subr.msk.bf16.mxu1 %vm3012_vm3, %v2558_v43  ;;  %v2028_v43 = vld [vmem:[%s3687_s6 + $0x320] sm:$0xff]  ;;  %v2637_v47 = vpack.c.bf16 %v2045_v37, %v2044_v36  ;;  %v2019_v36 = vld [vmem:[%s3687_s6 + $0x2f0] sm:$0xff]  ;;  %v2020_v37 = vld [vmem:[%s3687_s6 + $0x2f8] sm:$0xf] }
 0x211   :  { %v2639_v52 = vpack.c.bf16 %v2029_v44, %v2028_v43  ;;  %v2003_v43 = vld [vmem:[%s3687_s6 + $0x270] sm:$0xff]  ;;  %v2624_v44 = vpack.c.bf16 %v2020_v37, %v2019_v36 }
 0x213   :  { %2562 = vmatpush3.bf16.msra.mxu1 %v2561_v48  ;;  %v2012_v48 = vld [vmem:[%s3687_s6 + $0x2b8] sm:$0xff] }
 0x214   :  { %2597 = vmatprep.subr.bf16.mxu1 %v2596_v56  ;;  %v2608_v56 = vpack.c.bf16 %v2012_v48, %v2011_v45  ;;  %v2039_v48 = vld [vmem:[%s3687_s6 + $0x378] sm:$0xff] }
 0x2c5   :  { %v471_v61 = vpop.f32.mrb[2].mxu1 }
 0x2c6   :  { %v553_v62 = vrot.slane %v471_v61, %v3278_v60  ;;  %v473_v63 = vpop.f32.mrb[3].mxu1  ;;  %v2014_v61 = vld [vmem:[%s3687_s6 + $0x2c8] sm:$0xff] }
 0x2c7   :  { %v557_v0 = vrot.slane %v473_v63, %v3278_v60  ;;  %v2049_v63 = vld [vmem:[%s3687_s6 + $0x3c8] sm:$0xff] }
 0x2c8   :  { %v558_v1 = vmul.f32 %v553_v62, %v3020_v13  ;;  %v560_v2 = vmul.f32 %v553_v62, %v3026_v16  ;;  %v1990_v13 = vld [vmem:[%s3687_s6 + $0x208] sm:$0xff]  ;;  %v2048_v62 = vld [vmem:[%s3687_s6 + $0x3c0] sm:$0xff] }
 0x2c9   :  { %v559_v3 = vmul.f32 %v557_v0, %v3022_v14  ;;  %v561_v4 = vmul.f32 %v557_v0, %v3034_v20  ;;  %v545_v5 = vpop.f32.mrb[4].mxu1  ;;  %v2024_v14 = vld [vmem:[%s3687_s6 + $0x300] sm:$0xff]  ;;  %v2025_v16 = vld [vmem:[%s3687_s6 + $0x308] sm:$0xff]  ;;  %v2598_v24 = vpack.c.bf16 %v1990_v13, %v1989_v10  ;;  %v2610_v0 = vpack.c.bf16 %v1996_v55, %v1995_v53  ;;  %v2016_v10 = vld [vmem:[%s3687_s6 + $0x2d8] sm:$0xff] }
 0x2ca   :  { %v565_v6 = vrot.slane %v545_v5, %v3278_v60  ;;  %v547_v8 = vpop.f32.mrb[5].mxu1  ;;  %v2631_v25 = vpack.c.bf16 %v2025_v16, %v2024_v14  ;;  %v2645_v5 = vpack.c.bf16 %v2049_v63, %v2048_v62  ;;  %v1999_v16 = vld [vmem:[%s3687_s6 + $0x250] sm:$0xff]  ;;  %v1499_v62 = vld [vmem:[%s3693_s12] sm:$0xff] }
 0x2cb   :  { %v569_v9 = vrot.slane %v547_v8, %v3278_v60  ;;  %v2033_v8 = vld [vmem:[%s3687_s6 + $0x348] sm:$0xff] }
 0x2cc   :  { %v570_v12 = vadd.f32 %v565_v6, %v558_v1  ;;  %v572_v15 = vadd.f32 %v565_v6, %v560_v2  ;;  %v2643_v1 = vpack.c.bf16 %v2031_v58, %v2030_v57  ;;  %v1997_v2 = vld [vmem:[%s3687_s6 + $0x240] sm:$0xff]  ;;  %v1060_v58 = vld [vmem:[%s3688_s7 + $0x30] sm:$0xff] }
 0x2cd   :  { %v571_v20 = vadd.f32 %v569_v9, %v559_v3  ;;  %v573_v17 = vadd.f32 %v569_v9, %v561_v4  ;;  %v1998_v3 = vld [vmem:[%s3687_s6 + $0x248] sm:$0xff]  ;;  %v2612_v4 = vpack.c.bf16 %v2014_v61, %v2013_v59  ;;  %v2032_v6 = vld [vmem:[%s3687_s6 + $0x340] sm:$0xff]  ;;  %v2015_v9 = vld [vmem:[%s3687_s6 + $0x2d0] sm:$0xff] }
 0x2ce   :  { %v3315_v27 = vmax.f32 %v570_v12, 0.0  ;;  %v3350_v42 = vmax.f32 %v572_v15, 0.0  ;;  %v2050_v12 = vld [vmem:[%s3687_s6 + $0x3d0] sm:$0xff]  ;;  %v2051_v15 = vld [vmem:[%s3687_s6 + $0x3d8] sm:$0xff]  ;;  %v2614_v13 = vpack.c.bf16 %v1998_v3, %v1997_v2  ;;  %v2647_v14 = vpack.c.bf16 %v2033_v8, %v2032_v6 }
 0x2cf   :  { %v575_v23 = vmax.f32 %v571_v20, 0.0  ;;  %v3331_v34 = vmax.f32 %v573_v17, 0.0  ;;  %v2000_v20 = vld [vmem:[%s3687_s6 + $0x258] sm:$0xff]  ;;  %v2616_v17 = vpack.c.bf16 %v2016_v10, %v2015_v9  ;;  %v2649_v18 = vpack.c.bf16 %v2051_v15, %v2050_v12 }
 0x2d0   :  { %v2618_v26 = vpack.c.bf16 %v2000_v20, %v1999_v16  ;;  %v1061_v59 = vld [vmem:[%s3688_s7 + $0x38] sm:$0x7f] }
 0x2d1   :  { %1952 = vmatprep.mubr.msk.f32.mxu1 %vm169_vm4, %v575_v23  ;;  %1987 = vmatprep.mubr.msk.f32.mxu0 %vm169_vm4, %v575_v23  ;;  %v2672_v61 = vpack.c.bf16 %v1061_v59, %v1060_v58 }
 0x2d2   :  { %684 = vmatmul.mubr.f32.vlgmr.msra.gmra.mrb[6].mxu1 %v3315_v27  ;;  %795 = vmatmul.mubr.f32.vlgmr.msra.gmra.mrb[6].mxu0 %v3315_v27 }
 0x2d3   :  { %2599 = vmatpush3.bf16.msra.mxu1 %v2598_v24  ;;  %2632 = vmatpush3.bf16.msra.mxu0 %v2631_v25  ;;  %v2052_v24 = vld [vmem:[%s3687_s6 + $0x3e0] sm:$0xff]  ;;  %v2053_v25 = vld [vmem:[%s3687_s6 + $0x3e8] sm:$0xff] }
 0x2d4   :  { %1953 = vmatprep.mubr.msk.f32.mxu1 %vm169_vm4, %v3331_v34  ;;  %1988 = vmatprep.mubr.msk.f32.mxu0 %vm169_vm4, %v3331_v34 }
 0x2d5   :  { %2601 = vmatprep.subr.bf16.mxu1 %v2600_v31  ;;  %2634 = vmatprep.subr.bf16.mxu0 %v2633_v32  ;;  %v2653_v32 = vpack.c.bf16 %v2053_v25, %v2052_v24 }
 0x2d6   :  { %689 = vmatmul.mubr.f32.gmra.mrb[8].mxu1 %v3350_v42  ;;  %800 = vmatmul.mubr.f32.gmra.mrb[8].mxu0 %v3350_v42 }
 0x2d7   :  { %2603 = vmatpush3.bf16.msra.mxu1 %v2602_v38  ;;  %2636 = vmatpush3.bf16.msra.mxu0 %v2635_v39  ;;  %v2054_v38 = vld [vmem:[%s3687_s6 + $0x3f0] sm:$0xff]  ;;  %v2055_v39 = vld [vmem:[%s3687_s6 + $0x3f8] sm:$0xf] }
 0x2d8   :  { %2022 = vmatprep.mubr.msk.f32.mxu1 %vm169_vm4, %v575_v23  ;;  %2057 = vmatprep.mubr.msk.f32.mxu0 %vm169_vm4, %v575_v23  ;;  %v2018_v23 = vld [vmem:[%s3687_s6 + $0x2e8] sm:$0xff]  ;;  %v2657_v45 = vpack.c.bf16 %v2055_v39, %v2054_v38 }
 0x2d9   :  { %2605 = vmatprep.subr.bf16.mxu1 %v2604_v46  ;;  %2638 = vmatprep.subr.bf16.mxu0 %v2637_v47  ;;  %v2620_v31 = vpack.c.bf16 %v2018_v23, %v2017_v22  ;;  %v2004_v46 = vld [vmem:[%s3687_s6 + $0x278] sm:$0xff]  ;;  %v2038_v47 = vld [vmem:[%s3687_s6 + $0x370] sm:$0xff] }
 0x2da   :  { %v2627_v49 = vpack.c.bf16 %v2004_v46, %v2003_v43  ;;  %v2660_v50 = vpack.c.bf16 %v2039_v48, %v2038_v47 }
 0x2db   :  { %2607 = vmatpush3.bf16.msra.mxu1 %v2606_v51  ;;  %2640 = vmatpush3.bf16.msra.mxu0 %v2639_v52  ;;  %v1054_v51 = vld [vmem:[%s3688_s7] sm:$0xff]  ;;  %v1055_v52 = vld [vmem:[%s3688_s7 + $0x8] sm:$0xff] }
 0x2dc   :  { %2609 = vmatprep.subr.bf16.mxu1 %v2608_v56  ;;  %2642 = vmatprep.subr.bf16.mxu0 %v2641_v54  ;;  %v2663_v53 = vpack.c.bf16 %v1055_v52, %v1054_v51  ;;  %v1058_v56 = vld [vmem:[%s3688_s7 + $0x20] sm:$0xff]  ;;  %v1059_v54 = vld [vmem:[%s3688_s7 + $0x28] sm:$0xff] }
 0x2dd   :  { %v2669_v57 = vpack.c.bf16 %v1059_v54, %v1058_v56 }
 0x2df   :  { %2611 = vmatpush3.bf16.msra.mxu1 %v2610_v0  ;;  %2644 = vmatpush3.bf16.msra.mxu0 %v2643_v1 }
 0x2e0   :  { %2613 = vmatprep.subr.bf16.mxu1 %v2612_v4  ;;  %2646 = vmatprep.subr.bf16.mxu0 %v2645_v5 }
 0x2e3   :  { %2615 = vmatpush3.bf16.msra.mxu1 %v2614_v13  ;;  %2648 = vmatpush3.bf16.msra.mxu0 %v2647_v14 }
 0x2e4   :  { %2617 = vmatprep.subr.bf16.mxu1 %v2616_v17  ;;  %2650 = vmatprep.subr.bf16.mxu0 %v2649_v18 }
 0x2e7   :  { %2619 = vmatpush3.bf16.msra.mxu1 %v2618_v26  ;;  %2652 = vmatpush3.bf16.msra.mxu0 %v2651_v28 }
 0x2e8   :  { %2621 = vmatprep.subr.bf16.mxu1 %v2620_v31  ;;  %2654 = vmatprep.subr.bf16.mxu0 %v2653_v32 }
 0x2eb   :  { %2623 = vmatpush3.bf16.msra.mxu1 %v2622_v40  ;;  %2656 = vmatpush3.bf16.msra.mxu0 %v2655_v41 }
 0x2ec   :  { %2626 = vmatprep.subr.msk.bf16.mxu1 %vm3012_vm3, %v2624_v44  ;;  %2659 = vmatprep.subr.msk.bf16.mxu0 %vm3012_vm3, %v2657_v45 }
 0x2ef   :  { %2628 = vmatpush3.bf16.msra.mxu1 %v2627_v49  ;;  %2661 = vmatpush3.bf16.msra.mxu0 %v2660_v50 }
 0x2f2   :  { %908 = vmatmul.mubr.f32.vlgmr.msra.gmra.mrb[10].mxu1 %v3315_v27  ;;  %1021 = vmatmul.mubr.f32.vlgmr.msra.gmra.mrb[10].mxu0 %v3315_v27  ;;  %v2759_v27 = vmov 0.0|0.0  }
 0x2f3   :  { %2023 = vmatprep.mubr.msk.f32.mxu1 %vm169_vm4, %v3331_v34  ;;  %2058 = vmatprep.mubr.msk.f32.mxu0 %vm169_vm4, %v3331_v34  ;;  %v1056_v34 = vld [vmem:[%s3688_s7 + $0x10] sm:$0xff] }
 0x2f4   :  { %2662 = vmatprep.subr.bf16.mxu1 %v2759_v27  ;;  %2675 = vmatprep.subr.bf16.mxu0 %v2759_v27 }
 0x2f5   :  { %2664 = vmatpush3.bf16.msra.mxu1 %v2663_v53  ;;  %2677 = vmatpush3.bf16.msra.mxu0 %v2663_v53 }
 0x2f6   :  { %913 = vmatmul.mubr.f32.gmra.mrb[12].mxu1 %v3350_v42  ;;  %1026 = vmatmul.mubr.f32.gmra.mrb[12].mxu0 %v3350_v42  ;;  %v1057_v42 = vld [vmem:[%s3688_s7 + $0x18] sm:$0xff] }
 0x2f7   :  { %2665 = vmatprep.subr.bf16.mxu1 %v2759_v27  ;;  %2678 = vmatprep.subr.bf16.mxu0 %v2759_v27  ;;  %v2666_v55 = vpack.c.bf16 %v1057_v42, %v1056_v34  ;;  %v1222_v34 = vld [vmem:[%s3689_s8] sm:$0x7f] }
 0x2f8   :  { %2366 = vmatprep.mubr.msk.f32.mxu1 %vm2760_vm8, %v2757_v7  ;;  %2385 = vmatprep.mubr.msk.f32.mxu0 %vm2760_vm8, %v2757_v7  ;;  %v1386_v42 = vld [vmem:[%s3692_s11] sm:$0xff] }
 0x2f9   :  { %2667 = vmatpush3.bf16.msra.mxu1 %v2666_v55  ;;  %2680 = vmatpush3.bf16.msra.mxu0 %v2666_v55  ;;  %v1387_v55 = vld [vmem:[%s3692_s11 + $0x8] sm:$0xff] }
 0x2fa   :  { %2668 = vmatprep.subr.bf16.mxu1 %v2759_v27  ;;  %2681 = vmatprep.subr.bf16.mxu0 %v2759_v27  ;;  %v2688_v56 = vpack.c.bf16 %v1387_v55, %v1386_v42 }
 0x2fd   :  { %2670 = vmatpush3.bf16.msra.mxu1 %v2669_v57  ;;  %2683 = vmatpush3.bf16.msra.mxu0 %v2669_v57 }
 0x2fe   :  { %2671 = vmatprep.subr.bf16.mxu1 %v2759_v27  ;;  %2684 = vmatprep.subr.bf16.mxu0 %v2759_v27 }
 0x301   :  { %2674 = vmatpush3.bf16.msk.msra.mxu1 %vm3532_vm7, %v2672_v61  ;;  %2687 = vmatpush3.bf16.msk.msra.mxu0 %vm3532_vm7, %v2672_v61 }
 0x302   :  { %2388 = vmatprep.subr.mxu1 %v2757_v7  ;;  %2689 = vmatprep.subr.bf16.mxu0 %v2688_v56 }
 0x3a5   :  { %v2184_v63 = vpop.f32.mrb[6].mxu1  ;;  %v2222_v0 = vpop.f32.mrb[6].mxu0 }
 0x3a6   :  { %v2185_v1 = vpop.f32.mrb[7].mxu1  ;;  %v2223_v2 = vpop.f32.mrb[7].mxu0 }
 0x3a7   :  { %v2186_v3 = vadd.f32 %v2185_v1, %v2184_v63  ;;  %v2224_v4 = vadd.f32 %v2223_v2, %v2222_v0 }
 0x3a9   :  { %v805_v5 = vmax.f32 %v2186_v3, %v2224_v4  ;;  %v2187_v6 = vpop.f32.mrb[8].mxu1  ;;  %v2225_v8 = vpop.f32.mrb[8].mxu0  ;;  %v1215_v3 = vld [vmem:[%s3690_s9] sm:$0x1]  ;;  %s1928_s9 = sshll.u32 %s2761_s21, 4  ;;  %s1929_s9 = int_to_ptr.vmem [resolvable:$true] %s1928_s9 }
 0x3aa   :  { %v2188_v9 = vpop.f32.mrb[9].mxu1  ;;  %v2226_v10 = vpop.f32.mrb[9].mxu0  ;;  %s2733_s22 = scalar_lea.vmem %s1929_s9, 256  ;;  %p2738_p1 = scmp.lt.s32.totalorder %s1929_s9, %s1929_s9 }
 0x3ab   :  { %v2189_v12 = vadd.f32 %v2188_v9, %v2187_v6  ;;  %v2227_v15 = vadd.f32 %v2226_v10, %v2225_v8  ;;  %v1219_v6 = vld [vmem:[%s3691_s10] sm:$0x1]  ;;  %v1388_v10 = vld [vmem:[%s3692_s11 + $0x10] sm:$0xff]  ;;  %p2734_p0 = scmp.ne.s32.totalorder %s1929_s9, %s2733_s22  ;;  %p2739_p2 = scmp.lt.s32.totalorder %s2733_s22, %s2733_s22 }
 0x3ad   :  { %v806_v13 = vmax.f32 %v2189_v12, %v2227_v15  ;;  %v1389_v12 = vld [vmem:[%s3692_s11 + $0x18] sm:$0xff]  ;;  %p2740_p3 = por %p2739_p2, %p2738_p1 }
 0x3ae   :  { %v2692_v15 = vpack.c.bf16 %v1389_v12, %v1388_v10  ;;  %v1827_v12 = vld [vmem:[%s3697_s16] sm:$0xff] }
 0x3af   :  { %p2741_p4 = pnand %p2740_p3, %p2734_p0 }
 0x3c5   :  { %v2260_v14 = vpop.f32.mrb[10].mxu1  ;;  %v2298_v16 = vpop.f32.mrb[10].mxu0 }
 0x3c6   :  { %v2261_v20 = vpop.f32.mrb[11].mxu1  ;;  %v2299_v17 = vpop.f32.mrb[11].mxu0 }
 0x3c7   :  { %v2262_v18 = vadd.f32 %v2261_v20, %v2260_v14  ;;  %v2300_v19 = vadd.f32 %v2299_v17, %v2298_v16  ;;  %v1391_v14 = vld [vmem:[%s3692_s11 + $0x28] sm:$0xff]  ;;  %v1392_v20 = vld [vmem:[%s3692_s11 + $0x30] sm:$0xff]  ;;  %v1393_v17 = vld [vmem:[%s3692_s11 + $0x38] sm:$0x7f] }
 0x3c9   :  { %v918_v21 = vmax.f32 %v805_v5, %v2262_v18  ;;  %v2263_v22 = vpop.f32.mrb[12].mxu1  ;;  %v2301_v23 = vpop.f32.mrb[12].mxu0  ;;  %v2700_v18 = vpack.c.bf16 %v1393_v17, %v1392_v20 }
 0x3ca   :  { %v2264_v24 = vpop.f32.mrb[13].mxu1  ;;  %v2302_v25 = vpop.f32.mrb[13].mxu0 }
 0x3cb   :  { %v3545_v26 = vmax.f32 %v918_v21, %v2300_v19  ;;  %v2265_v28 = vadd.f32 %v2264_v24, %v2263_v22  ;;  %v2303_v29 = vadd.f32 %v2302_v25, %v2301_v23 }
 0x3cd   :  { %v919_v30 = vmax.f32 %v806_v13, %v2265_v28  ;;  %v1043_v31 = vmul.f32 %v3545_v26, %v3545_v26  ;;  %v1034_v33 = vsel %vm1033_vm9, %v3545_v26, 0.0  ;;  %v1390_v13 = vld [vmem:[%s3692_s11 + $0x20] sm:$0xff] }
 0x3ce   :  { %v2696_v16 = vpack.c.bf16 %v1391_v14, %v1390_v13 }
 0x3cf   :  { %v3549_v32 = vmax.f32 %v919_v30, %v2303_v29  ;;  %v1045_v38 = vsel %vm1033_vm9, %v1043_v31, 0.0 }
 0x3d1   :  { %v1035_v35 = vsel %vm1033_vm9, %v3549_v32, 0.0  ;;  %v1044_v36 = vmul.f32 %v3549_v32, %v3549_v32 }
 0x3d2   :  { %v1036_v37 = vadd.f32 %v1035_v35, %v1034_v33 }
 0x3d3   :  { %v1046_v39 = vsel %vm1033_vm9, %v1044_v36, 0.0 }
 0x3d4   :  { %v1037_v40 = vrot.slane %v1036_v37, 4  ;;  %v1047_v41 = vadd.f32 %v1046_v39, %v1045_v38 }
 0x3d6   :  { %v1038_v43 = vadd.f32 %v1037_v40, %v1036_v37  ;;  %v1048_v44 = vrot.slane %v1047_v41, 4 }
 0x3d8   :  { %v1039_v45 = vrot.slane %v1038_v43, 2  ;;  %v1049_v46 = vadd.f32 %v1048_v44, %v1047_v41 }
 0x3da   :  { %v1040_v47 = vadd.f32 %v1039_v45, %v1038_v43  ;;  %v1050_v48 = vrot.slane %v1049_v46, 2 }
 0x3dc   :  { %v1041_v49 = vrot.slane %v1040_v47, 1  ;;  %v1051_v50 = vadd.f32 %v1050_v48, %v1049_v46 }
 0x3de   :  { %v1042_v51 = vadd.f32 %v1041_v49, %v1040_v47  ;;  %v1052_v52 = vrot.slane %v1051_v50, 1 }
 0x3e0   :  { %v1053_v53 = vadd.f32 %v1052_v52, %v1051_v50  ;;  %2367 = vmatmul.mubr.msk.f32.vlgmr.msra.gmra.mrb[14].mxu1 %vm1033_vm9, %v1042_v51 }
 0x3e1   :  { %2390 = vmatprep.mubr.msk.f32.mxu1 %vm2760_vm8, %v2757_v7  ;;  %2389 = vmatpush3.msk.msra.mxu1 %vm398_vm5, %v1222_v34 }
 0x3e2   :  { %2386 = vmatmul.mubr.msk.f32.vlgmr.msra.gmra.mrb[14].mxu0 %vm1033_vm9, %v1053_v53  ;;  %2393 = vmatprep.subr.mxu1 %v2757_v7 }
 0x3e3   :  { %2691 = vmatpush3.bf16.msra.mxu0 %v2688_v56 }
 0x3e4   :  { %2693 = vmatprep.subr.bf16.mxu0 %v2692_v15 }
 0x3e7   :  { %2695 = vmatpush3.bf16.msra.mxu0 %v2692_v15  ;;  %v1828_v15 = vld [vmem:[%s3697_s16 + $0x8] sm:$0xf] }
 0x3e8   :  { %2697 = vmatprep.subr.bf16.mxu0 %v2696_v16  ;;  %v2714_v13 = vpack.c.bf16 %v1828_v15, %v1827_v12 }
 0x3eb   :  { %2699 = vmatpush3.bf16.msra.mxu0 %v2696_v16 }
 0x3ec   :  { %2702 = vmatprep.subr.msk.bf16.mxu0 %vm3532_vm7, %v2700_v18 }
 0x3ef   :  { %2705 = vmatpush3.bf16.msk.msra.mxu0 %vm3532_vm7, %v2700_v18 }
 0x3f0   :  { %2716 = vmatprep.subr.msk.bf16.mxu0 %vm3012_vm3, %v2714_v13 }
 0x4b3   :  { %v1134_v54 = vpop.f32.mrb[14].mxu1 }
 0x4b4   :  { %v1138_v57 = vmul.f32 0.0069444445, %v1134_v54  ;;  %v2368_v58 = vpop.f32.mrb[15].mxu1  ;;  %v1661_v54 = vld [vmem:[%s3694_s13] sm:$0x7] }
 0x4b5   :  { %v1208_v59 = vpop.f32.mrb[14].mxu0 }
 0x4b6   :  { %v1213_v61 = vmul.f32 %v1138_v57, %v1138_v57  ;;  %v1212_v63 = vmul.f32 0.0069444445, %v1208_v59  ;;  %v2387_v0 = vpop.f32.mrb[15].mxu0 }
 0x4b8   :  { %v1214_v1 = vsub.f32 %v1212_v63, %v1213_v61 }
 0x4ba   :  { %v1216_v2 = vadd.f32 1e-05, %v1214_v1 }
 0x4bc   :  { %2729 = vrsqrt.f32 %v1216_v2 }
 0x4c6   :  { %v2730_v4 = vpop.eup %2729 }
 0x4c7   :  { %v1218_v5 = vmul.f32 %v2730_v4, %v1215_v3  ;;  %v1654_v4 = vld [vmem:[%s3695_s14] sm:$0x1] }
 0x4c9   :  { %2391 = vmatmul.mubr.msk.f32.vlgmr.msra.gmra.mrb[16].mxu1 %vm394_vm6, %v1218_v5  ;;  %v1220_v8 = vmul.f32 %v1218_v5, %v1138_v57 }
 0x4ca   :  { %2394 = vmatpush3.msk.msra.mxu1 %vm398_vm5, %v1222_v34  ;;  %2395 = vmatprep.mubr.msk.f32.mxu1 %vm2760_vm8, %v2757_v7 }
 0x4cb   :  { %v1221_v9 = vsub.f32 %v1219_v6, %v1220_v8  ;;  %2706 = vmatprep.subr.bf16.mxu1 %v2759_v27  ;;  %v1658_v8 = vld [vmem:[%s3696_s15] sm:$0x1] }
 0x4cd   :  { %2396 = vmatmul.mubr.msk.f32.vlgmr.msra.gmra.mrb[18].mxu1 %vm394_vm6, %v1221_v9 }
 0x4ce   :  { %2421 = vmatprep.mubr.msk.f32.mxu1 %vm2760_vm8, %v2757_v7 }
 0x59c   :  { %v1295_v19 = vpop.f32.mrb[16].mxu1 }
 0x59d   :  { %v1375_v21 = vrot.slane %v1295_v19, %v3278_v60  ;;  %v2392_v22 = vpop.f32.mrb[17].mxu1 }
 0x59f   :  { %v1376_v24 = vmul.f32 %v1375_v21, %v3545_v26  ;;  %v1377_v25 = vmul.f32 %v1375_v21, %v3549_v32  ;;  %v1500_v26 = vld [vmem:[%s3693_s12 + $0x8] sm:$0xf] }
 0x5a0   :  { %v1368_v23 = vpop.f32.mrb[18].mxu1  ;;  %v2707_v32 = vpack.c.bf16 %v1500_v26, %v1499_v62 }
 0x5a1   :  { %v1381_v28 = vrot.slane %v1368_v23, %v3278_v60  ;;  %v2397_v29 = vpop.f32.mrb[19].mxu1 }
 0x5a2   :  { %2709 = vmatpush3.bf16.msk.msra.mxu1 %vm3012_vm3, %v2707_v32 }
 0x5a3   :  { %v1382_v30 = vadd.f32 %v1381_v28, %v1376_v24  ;;  %v1383_v31 = vadd.f32 %v1381_v28, %v1377_v25  ;;  %2710 = vmatprep.subr.bf16.mxu1 %v2759_v27 }
 0x5a5   :  { %v1384_v33 = vmax.f32 %v1382_v30, 0.0  ;;  %v1385_v35 = vmax.f32 %v1383_v31, 0.0 }
 0x5a7   :  { %2414 = vmatprep.mubr.msk.f32.mxu0 %vm1033_vm9, %v1384_v33 }
 0x5a8   :  { %2415 = vmatmul.mubr.msk.f32.vlgmr.msra.gmra.mrb[16].mxu0 %vm1033_vm9, %v1385_v35 }
 0x5a9   :  { %2719 = vmatpush3.bf16.msk.msra.mxu0 %vm3012_vm3, %v2714_v13 }
 0x67b   :  { %v2416_v36 = vpop.f32.mrb[16].mxu0 }
 0x67c   :  { %v1480_v37 = vsel %vm1478_vm10, %v2416_v36, 0.0  ;;  %v1489_v38 = vmul.f32 %v2416_v36, %v2416_v36  ;;  %v1469_v39 = vpop.f32.mrb[17].mxu0 }
 0x67d   :  { %v1479_v40 = vsel %vm1478_vm10, %v1469_v39, 0.0  ;;  %v1488_v41 = vmul.f32 %v1469_v39, %v1469_v39 }
 0x67e   :  { %v1491_v43 = vsel %vm1478_vm10, %v1489_v38, 0.0  ;;  %v1481_v44 = vadd.f32 %v1480_v37, %v1479_v40 }
 0x67f   :  { %v1490_v45 = vsel %vm1478_vm10, %v1488_v41, 0.0 }
 0x680   :  { %v1482_v46 = vrot.slane %v1481_v44, 4  ;;  %v1492_v47 = vadd.f32 %v1491_v43, %v1490_v45 }
 0x682   :  { %v1483_v48 = vadd.f32 %v1482_v46, %v1481_v44  ;;  %v1493_v49 = vrot.slane %v1492_v47, 4 }
 0x684   :  { %v1484_v50 = vrot.slane %v1483_v48, 2  ;;  %v1494_v27 = vadd.f32 %v1493_v49, %v1492_v47 }
 0x686   :  { %v1485_v51 = vadd.f32 %v1484_v50, %v1483_v48  ;;  %v1495_v52 = vrot.slane %v1494_v27, 2 }
 0x688   :  { %v1486_v53 = vrot.slane %v1485_v51, 1  ;;  %v1496_v34 = vadd.f32 %v1495_v52, %v1494_v27 }
 0x68a   :  { %v1487_v42 = vadd.f32 %v1486_v53, %v1485_v51  ;;  %v1497_v55 = vrot.slane %v1496_v34, 1 }
 0x68c   :  { %2422 = vmatmul.mubr.msk.f32.vlgmr.msra.gmra.mrb[20].mxu1 %vm1478_vm10, %v1487_v42  ;;  %v1498_v56 = vadd.f32 %v1497_v55, %v1496_v34 }
 0x68d   :  { %2713 = vmatpush3.bf16.msk.msra.mxu1 %vm3012_vm3, %v2707_v32  ;;  %2428 = vmatprep.mubr.msk.f32.mxu1 %vm2760_vm8, %v2757_v7 }
 0x68e   :  { %2431 = vmatprep.subr.mxu1 %v2757_v7 }
 0x690   :  { %2429 = vmatmul.mubr.msk.f32.vlgmr.msra.gmra.mrb[22].mxu1 %vm1478_vm10, %v1498_v56 }
 0x691   :  { %2433 = vmatprep.mubr.msk.f32.mxu1 %vm2760_vm8, %v2757_v7  ;;  %2432 = vmatpush3.msk.msra.mxu1 %vm1666_vm11, %v1661_v54 }
 0x692   :  { %2436 = vmatprep.subr.mxu1 %v2757_v7 }
 0x75f   :  { %v1573_v57 = vpop.f32.mrb[20].mxu1 }
 0x760   :  { %v1577_v58 = vmul.f32 0.015625, %v1573_v57  ;;  %v2423_v59 = vpop.f32.mrb[21].mxu1 }
 0x762   :  { %v1652_v63 = vmul.f32 %v1577_v58, %v1577_v58 }
 0x763   :  { %v1647_v61 = vpop.f32.mrb[22].mxu1 }
 0x764   :  { %v1651_v0 = vmul.f32 0.015625, %v1647_v61  ;;  %v2430_v1 = vpop.f32.mrb[23].mxu1 }
 0x766   :  { %v1653_v2 = vsub.f32 %v1651_v0, %v1652_v63 }
 0x768   :  { %v1655_v3 = vadd.f32 1e-05, %v1653_v2 }
 0x76a   :  { %2731 = vrsqrt.f32 %v1655_v3 }
 0x774   :  { %v2732_v5 = vpop.eup %2731 }
 0x775   :  { %v1657_v6 = vmul.f32 %v2732_v5, %v1654_v4 }
 0x777   :  { %2434 = vmatmul.mubr.msk.f32.vlgmr.msra.gmra.mrb[24].mxu1 %vm1662_vm12, %v1657_v6  ;;  %v1659_v9 = vmul.f32 %v1657_v6, %v1577_v58 }
 0x778   :  { %2437 = vmatpush3.msk.msra.mxu1 %vm1666_vm11, %v1661_v54  ;;  %2438 = vmatprep.mubr.msk.f32.mxu1 %vm2760_vm8, %v2757_v7 }
 0x779   :  { %v1660_v10 = vsub.f32 %v1658_v8, %v1659_v9 }
 0x77b   :  { %2439 = vmatmul.mubr.msk.f32.vlgmr.msra.gmra.mrb[26].mxu1 %vm1662_vm12, %v1660_v10 }
 0x84a   :  { %v1736_v14 = vpop.f32.mrb[24].mxu1 }
 0x84b   :  { %v1816_v7 = vrot.slane %v1736_v14, %v3278_v60  ;;  %v2435_v16 = vpop.f32.mrb[25].mxu1 }
 0x84d   :  { %v1817_v20 = vmul.f32 %v1816_v7, %v1469_v39  ;;  %v1818_v17 = vmul.f32 %v2416_v36, %v1816_v7 }
 0x84e   :  { %v1809_v18 = vpop.f32.mrb[26].mxu1 }
 0x84f   :  { %v1822_v19 = vrot.slane %v1809_v18, %v3278_v60  ;;  %v2440_v21 = vpop.f32.mrb[27].mxu1 }
 0x851   :  { %v1823_v22 = vadd.f32 %v1822_v19, %v1817_v20  ;;  %v1824_v23 = vadd.f32 %v1822_v19, %v1818_v17 }
 0x853   :  { %v1825_v24 = vmax.f32 %v1823_v22, 0.0  ;;  %v1826_v25 = vmax.f32 %v1824_v23, 0.0 }
 0x855   :  { %2445 = vmatprep.mubr.msk.f32.mxu0 %vm1478_vm10, %v1825_v24 }
 0x856   :  { %2446 = vmatmul.mubr.msk.f32.vlgmr.msra.gmra.mrb[18].mxu0 %vm1478_vm10, %v1826_v25 }
 0x929   :  { %v2447_v28 = vpop.f32.mrb[18].mxu0 }
 0x92a   :  { %v1917_v29 = vadd.f32 %v2447_v28, %v2078_v11  ;;  %v1911_v30 = vpop.f32.mrb[19].mxu0 }
 0x92b   :  { %v1912_v60 = vadd.f32 %v2078_v11, %v1911_v30 }
 0x92c   :  { %1922 = vst.msk [vmem:[#allocation2 + $0x8] sm:$0xff] %vm1920_vm13, %v1917_v29 }
 0x92d   :  { %1921 = vst.msk [vmem:[#allocation2] sm:$0xff] %vm1920_vm13, %v1912_v60 }
 0x92e   :  { %2744 = shalt.err (!%p2741_p4)
}
 0x92f   :  { %s2745_s17 = scalar_lea.hbm %s3699_s18, 256 }
 0x930   :  { %p2746_p5 = scmp.ne.s32.totalorder %s3699_s18, %s2745_s17  ;;  %p2749_p6 = scmp.lt.u32.totalorder %s2745_s17, %s3699_s18 }
 0x932   :  { %p2751_p7 = pnand %p2749_p6, %p2746_p5 }
 0x934   :  { %2754 = shalt.err (!%p2751_p7)
}
 0x935   :  { %s2762_s26 = smov 128   ;;  %s2763_s3 = smov 8  }
 0x936   :  { %1934 = dma.vmem_to_hbm [thread:$0]  %s1929_s9, 256, %s3699_s18, [#allocation3], %s2762_s26, %s2762_s26, %s2763_s3  }
 0x937   :  { %2755 = dma.done.wait [#allocation3], 256  }
 0x938   :  { %2756 = vsyncadd [#allocation3], 4294967040 }
 0x939   :  { %1938 = vsyncpa [#allocation3], 1 }

</bundles_post_ra>
